<compile_context>
chip_gen: v5e
topology: v5e:2x2
jax: 0.10.0
libtpu: 0.0.40
codegen_flags: <defaults>
</compile_context>

<pallas_src>
import functools

import jax
import jax.numpy as jnp
from jax import lax
from jax.experimental import pallas as pl
from jax.experimental.pallas import tpu as pltpu

# ---------------- model hyper-parameters (shrunk for the demo) ----------------
N_VOCAB   = 7          # real vocab (padding_idx = n_vocab - 1 = 6)
V_PAD     = 8          # vocab padded to 8 rows for clean sublane tiling
D_MODEL   = 128
D_HIDDEN  = 384
NUM_ENC   = 2
N_CLASSES = 2
SEQ_LEN   = 16         # reference uses 593; shrunk for a small runnable demo
BATCH     = 2
LN_EPS    = 1e-5


def _silu(x):
    # sigmoid = 1/(1+exp(-x)); approx reciprocal keeps the divide on the EUP's
    # cheap vrcp path (EUP is the likely binding slot for this SiLU-heavy block).
    return x * pl.reciprocal(1.0 + jnp.exp(-x), approx=True)


# ------------------------------ fused Pallas kernel ---------------------------
def fused_forward_kernel(ids_ref, table_ref,
                         w_ug_ref, b_ug_ref, cw_ref, cb_ref,
                         w_out_ref, b_out_ref, gamma_ref, beta_ref,
                         w1_ref, b1_ref, w2_ref, b2_ref,
                         out_ref):
    """Whole forward pass for ONE sequence (S rows, D lanes), VMEM-resident."""
    S = ids_ref.shape[0]
    V, D = table_ref.shape
    L = w_ug_ref.shape[0]
    H = cw_ref.shape[-1]

    # --- embedding: one-hot (S, V) @ table (V, D) on the MXU -------------------
    # (padding row of the table is zero, so padding_idx semantics hold)
    ids = ids_ref[...]                                           # (S, 1) int32
    v_iota = lax.broadcasted_iota(jnp.int32, (S, V), 1)
    one_hot = jnp.where(ids == v_iota, 1.0, 0.0).astype(jnp.bfloat16)
    x = jnp.dot(one_hot, table_ref[...],
                preferred_element_type=jnp.float32)              # (S, D) f32

    # --- per-row sequence-boundary masks (conv is halo-free within the block) --
    s_pos = lax.broadcasted_iota(jnp.int32, (S, 1), 0)
    not_first = (s_pos != 0).astype(jnp.float32)                 # (S, 1)
    not_last = (s_pos != S - 1).astype(jnp.float32)              # (S, 1)

    # --- encoder stack (static unroll, NUM_ENC = 2) -----------------------------
    for l in range(L):
        xb = x.astype(jnp.bfloat16)
        # fused u/g projection: one (S, D) @ (D, 2H) matmul, split by lane slices
        ug = jnp.dot(xb, w_ug_ref[l],
                     preferred_element_type=jnp.float32) + b_ug_ref[l]   # (S, 2H)
        u = ug[:, :H]
        g = ug[:, H:]

        # depthwise conv1d over the sequence axis (k=3, 'same'), shifts via
        # XLU sublane rolls; wrap-around rows are masked to zero.
        u_m1 = pltpu.roll(u, shift=1, axis=0) * not_first        # u[s-1]
        u_p1 = pltpu.roll(u, shift=S - 1, axis=0) * not_last     # u[s+1]
        cw = cw_ref[l]                                           # (3, H)
        conv = (u_m1 * cw[0:1, :] + u * cw[1:2, :] + u_p1 * cw[2:3, :]
                + cb_ref[l])

        # SiLU activation, SiLU gate, output projection (bf16 operands, f32 acc)
        act = (_silu(conv) * _silu(g)).astype(jnp.bfloat16)      # (S, H)
        y = jnp.dot(act, w_out_ref[l],
                    preferred_element_type=jnp.float32) + b_out_ref[l]

        # residual + LayerNorm over D (dropout = identity in eval mode)
        res = x + y
        mean = jnp.mean(res, axis=-1, keepdims=True)
        var = jnp.mean((res - mean) ** 2, axis=-1, keepdims=True)
        x = (res - mean) * lax.rsqrt(var + LN_EPS) * gamma_ref[l] + beta_ref[l]

    # --- classification head: mean-pool over sequence, 2-layer MLP -------------
    # Pooling commutes with the reference permute(0,2,1): plain sublane sum.
    pooled = jnp.sum(x, axis=0, keepdims=True) * (1.0 / S)       # (1, D)
    h = jnp.dot(pooled.astype(jnp.bfloat16), w1_ref[...],
                preferred_element_type=jnp.float32) + b1_ref[...]
    h = jnp.maximum(h, 0.0)
    logits = jnp.dot(h.astype(jnp.bfloat16), w2_ref[...],
                     preferred_element_type=jnp.float32) + b2_ref[...]   # (1, 2)
    out_ref[0] = logits


# ------------------------------ pallas_call wrapper ----------------------------
def fused_forward(ids, params):
    B, S = ids.shape
    ids_flat = ids.reshape(B * S, 1)

    enc = params["encoder"]
    cls = params["classifier"]
    args = (ids_flat, params["embedding"],
            enc["w_ug"], enc["b_ug"], enc["cw"], enc["cb"],
            enc["w_out"], enc["b_out"], enc["gamma"], enc["beta"],
            cls["w1"], cls["b1"], cls["w2"], cls["b2"])

    def const_spec(a):
        n = a.ndim
        # constant index_map -> fetched once, stays resident across grid steps
        return pl.BlockSpec(a.shape, lambda b, _n=n: (0,) * _n)

    in_specs = ([pl.BlockSpec((S, 1), lambda b: (b, 0))]          # one sequence/step
                + [const_spec(a) for a in args[1:]])

    out = pl.pallas_call(
        fused_forward_kernel,
        out_shape=jax.ShapeDtypeStruct((B, 1, N_CLASSES), jnp.float32),
        grid=(B,),
        in_specs=in_specs,
        out_specs=pl.BlockSpec((1, 1, N_CLASSES), lambda b: (b, 0, 0)),
        compiler_params=pltpu.CompilerParams(
            dimension_semantics=("parallel",),        # megacore split on v7x
            vmem_limit_bytes=32 * 1024 * 1024),
    )(*args)
    return out.reshape(B, N_CLASSES)


@jax.jit
def model_forward(ids, params):
    return fused_forward(ids, params)


# ------------------------------ parameters -------------------------------------
def _xavier(key, shape):
    fan_in, fan_out = shape[0], shape[1]
    limit = (6.0 / (fan_in + fan_out)) ** 0.5
    return jax.random.uniform(key, shape, jnp.float32, -limit, limit)


def make_params(key):
    k_emb, k_enc, k_cls = jax.random.split(key, 3)

    # embedding table, padded to V_PAD rows; padding_idx row (n_vocab-1=6) zeroed.
    table = 0.02 * jax.random.normal(k_emb, (V_PAD, D_MODEL), jnp.float32)
    table = table.at[N_VOCAB - 1].set(0.0)          # padding_idx row
    table = table.at[N_VOCAB:].set(0.0)             # unused padded rows
    table = table.astype(jnp.bfloat16)              # matmul operand (f32 accum)

    w_ug, cw, w_out = [], [], []
    for k in jax.random.split(k_enc, NUM_ENC):
        ks = jax.random.split(k, 4)
        wu = _xavier(ks[0], (D_MODEL, D_HIDDEN))
        wg = _xavier(ks[1], (D_MODEL, D_HIDDEN))
        w_ug.append(jnp.concatenate([wu, wg], axis=1))           # (D, 2H) fused
        cw.append(0.1 * jax.random.normal(ks[2], (3, D_HIDDEN), jnp.float32))
        w_out.append(_xavier(ks[3], (D_HIDDEN, D_MODEL)))

    encoder = {
        "w_ug": jnp.stack(w_ug).astype(jnp.bfloat16),            # (L, D, 2H)
        "b_ug": jnp.zeros((NUM_ENC, 1, 2 * D_HIDDEN), jnp.float32),
        "cw": jnp.stack(cw),                                     # (L, 3, H) f32
        "cb": jnp.zeros((NUM_ENC, 1, D_HIDDEN), jnp.float32),
        "w_out": jnp.stack(w_out).astype(jnp.bfloat16),          # (L, H, D)
        "b_out": jnp.zeros((NUM_ENC, 1, D_MODEL), jnp.float32),
        "gamma": jnp.ones((NUM_ENC, 1, D_MODEL), jnp.float32),
        "beta": jnp.zeros((NUM_ENC, 1, D_MODEL), jnp.float32),
    }

    kc1, kc2 = jax.random.split(k_cls)
    classifier = {
        "w1": _xavier(kc1, (D_MODEL, D_HIDDEN)).astype(jnp.bfloat16),
        "b1": jnp.zeros((1, D_HIDDEN), jnp.float32),
        "w2": _xavier(kc2, (D_HIDDEN, N_CLASSES)).astype(jnp.bfloat16),
        "b2": jnp.zeros((1, N_CLASSES), jnp.float32),
    }
    return {"embedding": table, "encoder": encoder, "classifier": classifier}


# ------------------------------ demo / smoke test -------------------------------
if __name__ == "__main__":
    key = jax.random.PRNGKey(0)
    k_ids, k_par = jax.random.split(key)
    ids = jax.random.randint(k_ids, (BATCH, SEQ_LEN), 0, N_VOCAB, dtype=jnp.int32)
    params = make_params(k_par)

    out = model_forward(ids, params)
    jax.block_until_ready(out)
    assert out.shape == (BATCH, N_CLASSES)
    assert out.dtype == jnp.float32
    print("KERNEL_OK")
</pallas_src>

<mosaic_0001>
module attributes {stable_mosaic.version = 11 : i64} {
  func.func @fused_forward_kernel(%arg0: i32, %arg1: memref<16x1xi32, #tpu.memory_space<vmem>>, %arg2: memref<8x128xbf16, #tpu.memory_space<vmem>>, %arg3: memref<2x128x768xbf16, #tpu.memory_space<vmem>>, %arg4: memref<2x1x768xf32, #tpu.memory_space<vmem>>, %arg5: memref<2x3x384xf32, #tpu.memory_space<vmem>>, %arg6: memref<2x1x384xf32, #tpu.memory_space<vmem>>, %arg7: memref<2x384x128xbf16, #tpu.memory_space<vmem>>, %arg8: memref<2x1x128xf32, #tpu.memory_space<vmem>>, %arg9: memref<2x1x128xf32, #tpu.memory_space<vmem>>, %arg10: memref<2x1x128xf32, #tpu.memory_space<vmem>>, %arg11: memref<128x384xbf16, #tpu.memory_space<vmem>>, %arg12: memref<1x384xf32, #tpu.memory_space<vmem>>, %arg13: memref<384x2xbf16, #tpu.memory_space<vmem>>, %arg14: memref<1x2xf32, #tpu.memory_space<vmem>>, %arg15: memref<1x1x2xf32, #tpu.memory_space<vmem>>) attributes {dimension_semantics = [#tpu.dimension_semantics<parallel>], iteration_bounds = array<i64: 2>, scalar_prefetch = 0 : i64, scratch_operands = 0 : i64, tpu.core_type = #tpu.core_type<tc>, window_params = [{transform_indices = @transform_0, window_bounds = array<i64: 16, 1>}, {pipeline_mode = #tpu.pipeline_mode<synchronous>, transform_indices = @transform_1, window_bounds = array<i64: 8, 128>}, {pipeline_mode = #tpu.pipeline_mode<synchronous>, transform_indices = @transform_2, window_bounds = array<i64: 2, 128, 768>}, {pipeline_mode = #tpu.pipeline_mode<synchronous>, transform_indices = @transform_3, window_bounds = array<i64: 2, 1, 768>}, {pipeline_mode = #tpu.pipeline_mode<synchronous>, transform_indices = @transform_4, window_bounds = array<i64: 2, 3, 384>}, {pipeline_mode = #tpu.pipeline_mode<synchronous>, transform_indices = @transform_5, window_bounds = array<i64: 2, 1, 384>}, {pipeline_mode = #tpu.pipeline_mode<synchronous>, transform_indices = @transform_6, window_bounds = array<i64: 2, 384, 128>}, {pipeline_mode = #tpu.pipeline_mode<synchronous>, transform_indices = @transform_7, window_bounds = array<i64: 2, 1, 128>}, {pipeline_mode = #tpu.pipeline_mode<synchronous>, transform_indices = @transform_8, window_bounds = array<i64: 2, 1, 128>}, {pipeline_mode = #tpu.pipeline_mode<synchronous>, transform_indices = @transform_9, window_bounds = array<i64: 2, 1, 128>}, {pipeline_mode = #tpu.pipeline_mode<synchronous>, transform_indices = @transform_10, window_bounds = array<i64: 128, 384>}, {pipeline_mode = #tpu.pipeline_mode<synchronous>, transform_indices = @transform_11, window_bounds = array<i64: 1, 384>}, {pipeline_mode = #tpu.pipeline_mode<synchronous>, transform_indices = @transform_12, window_bounds = array<i64: 384, 2>}, {pipeline_mode = #tpu.pipeline_mode<synchronous>, transform_indices = @transform_13, window_bounds = array<i64: 1, 2>}, {transform_indices = @transform_14, window_bounds = array<i64: 1, 1, 2>}]} {
    %c0 = arith.constant 0 : index
    %c0_0 = arith.constant 0 : index
    %0 = vector.load %arg1[%c0, %c0_0] : memref<16x1xi32, #tpu.memory_space<vmem>>, vector<16x1xi32>
    %1 = tpu.iota {dimensions = array<i32: 1>} : vector<16x8xi32>
    %2 = vector.broadcast %0 : vector<16x1xi32> to vector<16x8xi32>
    %3 = arith.cmpi eq, %2, %1 : vector<16x8xi32>
    %cst = arith.constant 1.000000e+00 : f32
    %cst_1 = arith.constant 0.000000e+00 : f32
    %4 = vector.broadcast %cst : f32 to vector<16x8xf32>
    %5 = vector.broadcast %cst_1 : f32 to vector<16x8xf32>
    %6 = arith.select %3, %4, %5 : vector<16x8xi1>, vector<16x8xf32>
    %7 = arith.truncf %6 : vector<16x8xf32> to vector<16x8xbf16>
    %c0_2 = arith.constant 0 : index
    %c0_3 = arith.constant 0 : index
    %8 = vector.load %arg2[%c0_2, %c0_3] : memref<8x128xbf16, #tpu.memory_space<vmem>>, vector<8x128xbf16>
    %cst_4 = arith.constant dense<0.000000e+00> : vector<16x128xf32>
    %9 = tpu.matmul %7, %8, %cst_4 {dimension_numbers = #tpu.dot_dimension_numbers<[1], [0], [0], [1], [0, 0, 1, 1], [], []>} : vector<16x8xbf16>, vector<8x128xbf16>, vector<16x128xf32> -> vector<16x128xf32>
    %10 = tpu.iota {dimensions = array<i32: 0>} : vector<16x1xi32>
    %c0_i32 = arith.constant 0 : i32
    %11 = vector.broadcast %c0_i32 : i32 to vector<16x1xi32>
    %12 = arith.cmpi ne, %10, %11 : vector<16x1xi32>
    %13 = arith.extui %12 : vector<16x1xi1> to vector<16x1xi32>
    %14 = arith.sitofp %13 : vector<16x1xi32> to vector<16x1xf32>
    %c15_i32 = arith.constant 15 : i32
    %15 = vector.broadcast %c15_i32 : i32 to vector<16x1xi32>
    %16 = arith.cmpi ne, %10, %15 : vector<16x1xi32>
    %17 = arith.extui %16 : vector<16x1xi1> to vector<16x1xi32>
    %18 = arith.sitofp %17 : vector<16x1xi32> to vector<16x1xf32>
    %19 = arith.truncf %9 : vector<16x128xf32> to vector<16x128xbf16>
    %c0_5 = arith.constant 0 : index
    %c0_6 = arith.constant 0 : index
    %c0_7 = arith.constant 0 : index
    %20 = vector.load %arg3[%c0_5, %c0_6, %c0_7] : memref<2x128x768xbf16, #tpu.memory_space<vmem>>, vector<1x128x768xbf16>
    %21 = vector.shape_cast %20 : vector<1x128x768xbf16> to vector<128x768xbf16>
    %cst_8 = arith.constant dense<0.000000e+00> : vector<16x768xf32>
    %22 = tpu.matmul %19, %21, %cst_8 {dimension_numbers = #tpu.dot_dimension_numbers<[1], [0], [0], [1], [0, 0, 1, 1], [], []>} : vector<16x128xbf16>, vector<128x768xbf16>, vector<16x768xf32> -> vector<16x768xf32>
    %c0_9 = arith.constant 0 : index
    %c0_10 = arith.constant 0 : index
    %c0_11 = arith.constant 0 : index
    %23 = vector.load %arg4[%c0_9, %c0_10, %c0_11] : memref<2x1x768xf32, #tpu.memory_space<vmem>>, vector<1x1x768xf32>
    %24 = vector.shape_cast %23 : vector<1x1x768xf32> to vector<1x768xf32>
    %25 = vector.broadcast %24 : vector<1x768xf32> to vector<16x768xf32>
    %26 = arith.addf %22, %25 : vector<16x768xf32>
    %27 = vector.extract_strided_slice %26 {offsets = [0, 0], sizes = [16, 384], strides = [1, 1]} : vector<16x768xf32> to vector<16x384xf32>
    %28 = vector.extract_strided_slice %26 {offsets = [0, 384], sizes = [16, 384], strides = [1, 1]} : vector<16x768xf32> to vector<16x384xf32>
    %c1_i32 = arith.constant 1 : i32
    %29 = tpu.dynamic_rotate %27 by %c1_i32 dim 0 : vector<16x384xf32>, i32 -> vector<16x384xf32>
    %30 = vector.broadcast %14 : vector<16x1xf32> to vector<16x384xf32>
    %31 = arith.mulf %29, %30 : vector<16x384xf32>
    %c15_i32_12 = arith.constant 15 : i32
    %32 = tpu.dynamic_rotate %27 by %c15_i32_12 dim 0 : vector<16x384xf32>, i32 -> vector<16x384xf32>
    %33 = vector.broadcast %18 : vector<16x1xf32> to vector<16x384xf32>
    %34 = arith.mulf %32, %33 : vector<16x384xf32>
    %c0_13 = arith.constant 0 : index
    %c0_14 = arith.constant 0 : index
    %c0_15 = arith.constant 0 : index
    %35 = vector.load %arg5[%c0_13, %c0_14, %c0_15] : memref<2x3x384xf32, #tpu.memory_space<vmem>>, vector<1x3x384xf32>
    %36 = vector.shape_cast %35 : vector<1x3x384xf32> to vector<3x384xf32>
    %37 = vector.extract_strided_slice %36 {offsets = [0, 0], sizes = [1, 384], strides = [1, 1]} : vector<3x384xf32> to vector<1x384xf32>
    %38 = vector.broadcast %37 : vector<1x384xf32> to vector<16x384xf32>
    %39 = arith.mulf %31, %38 : vector<16x384xf32>
    %40 = vector.extract_strided_slice %36 {offsets = [1, 0], sizes = [1, 384], strides = [1, 1]} : vector<3x384xf32> to vector<1x384xf32>
    %41 = vector.broadcast %40 : vector<1x384xf32> to vector<16x384xf32>
    %42 = arith.mulf %27, %41 : vector<16x384xf32>
    %43 = arith.addf %39, %42 : vector<16x384xf32>
    %44 = vector.extract_strided_slice %36 {offsets = [2, 0], sizes = [1, 384], strides = [1, 1]} : vector<3x384xf32> to vector<1x384xf32>
    %45 = vector.broadcast %44 : vector<1x384xf32> to vector<16x384xf32>
    %46 = arith.mulf %34, %45 : vector<16x384xf32>
    %47 = arith.addf %43, %46 : vector<16x384xf32>
    %c0_16 = arith.constant 0 : index
    %c0_17 = arith.constant 0 : index
    %c0_18 = arith.constant 0 : index
    %48 = vector.load %arg6[%c0_16, %c0_17, %c0_18] : memref<2x1x384xf32, #tpu.memory_space<vmem>>, vector<1x1x384xf32>
    %49 = vector.shape_cast %48 : vector<1x1x384xf32> to vector<1x384xf32>
    %50 = vector.broadcast %49 : vector<1x384xf32> to vector<16x384xf32>
    %51 = arith.addf %47, %50 : vector<16x384xf32>
    %cst_19 = arith.constant 0.000000e+00 : f32
    %52 = vector.broadcast %cst_19 : f32 to vector<16x384xf32>
    %53 = arith.subf %52, %51 : vector<16x384xf32>
    %54 = math.exp %53 : vector<16x384xf32>
    %cst_20 = arith.constant 1.000000e+00 : f32
    %55 = vector.broadcast %cst_20 : f32 to vector<16x384xf32>
    %56 = arith.addf %55, %54 : vector<16x384xf32>
    %57 = tpu.reciprocal %56 {approx = true} : vector<16x384xf32> -> vector<16x384xf32>
    %58 = arith.mulf %51, %57 : vector<16x384xf32>
    %cst_21 = arith.constant 0.000000e+00 : f32
    %59 = vector.broadcast %cst_21 : f32 to vector<16x384xf32>
    %60 = arith.subf %59, %28 : vector<16x384xf32>
    %61 = math.exp %60 : vector<16x384xf32>
    %cst_22 = arith.constant 1.000000e+00 : f32
    %62 = vector.broadcast %cst_22 : f32 to vector<16x384xf32>
    %63 = arith.addf %62, %61 : vector<16x384xf32>
    %64 = tpu.reciprocal %63 {approx = true} : vector<16x384xf32> -> vector<16x384xf32>
    %65 = arith.mulf %28, %64 : vector<16x384xf32>
    %66 = arith.mulf %58, %65 : vector<16x384xf32>
    %67 = arith.truncf %66 : vector<16x384xf32> to vector<16x384xbf16>
    %c0_23 = arith.constant 0 : index
    %c0_24 = arith.constant 0 : index
    %c0_25 = arith.constant 0 : index
    %68 = vector.load %arg7[%c0_23, %c0_24, %c0_25] : memref<2x384x128xbf16, #tpu.memory_space<vmem>>, vector<1x384x128xbf16>
    %69 = vector.shape_cast %68 : vector<1x384x128xbf16> to vector<384x128xbf16>
    %cst_26 = arith.constant dense<0.000000e+00> : vector<16x128xf32>
    %70 = tpu.matmul %67, %69, %cst_26 {dimension_numbers = #tpu.dot_dimension_numbers<[1], [0], [0], [1], [0, 0, 1, 1], [], []>} : vector<16x384xbf16>, vector<384x128xbf16>, vector<16x128xf32> -> vector<16x128xf32>
    %c0_27 = arith.constant 0 : index
    %c0_28 = arith.constant 0 : index
    %c0_29 = arith.constant 0 : index
    %71 = vector.load %arg8[%c0_27, %c0_28, %c0_29] : memref<2x1x128xf32, #tpu.memory_space<vmem>>, vector<1x1x128xf32>
    %72 = vector.shape_cast %71 : vector<1x1x128xf32> to vector<1x128xf32>
    %73 = vector.broadcast %72 : vector<1x128xf32> to vector<16x128xf32>
    %74 = arith.addf %70, %73 : vector<16x128xf32>
    %75 = arith.addf %9, %74 : vector<16x128xf32>
    %cst_30 = arith.constant dense<0.000000e+00> : vector<16xf32>
    %76 = vector.multi_reduction <add>, %75, %cst_30 [1] : vector<16x128xf32> to vector<16xf32>
    %77 = vector.shape_cast %76 : vector<16xf32> to vector<16x1xf32>
    %cst_31 = arith.constant 1.280000e+02 : f32
    %78 = vector.broadcast %cst_31 : f32 to vector<16x1xf32>
    %79 = arith.divf %77, %78 : vector<16x1xf32>
    %80 = vector.broadcast %79 : vector<16x1xf32> to vector<16x128xf32>
    %81 = arith.subf %75, %80 : vector<16x128xf32>
    %82 = arith.mulf %81, %81 : vector<16x128xf32>
    %cst_32 = arith.constant dense<0.000000e+00> : vector<16xf32>
    %83 = vector.multi_reduction <add>, %82, %cst_32 [1] : vector<16x128xf32> to vector<16xf32>
    %84 = vector.shape_cast %83 : vector<16xf32> to vector<16x1xf32>
    %cst_33 = arith.constant 1.280000e+02 : f32
    %85 = vector.broadcast %cst_33 : f32 to vector<16x1xf32>
    %86 = arith.divf %84, %85 : vector<16x1xf32>
    %87 = vector.broadcast %79 : vector<16x1xf32> to vector<16x128xf32>
    %88 = arith.subf %75, %87 : vector<16x128xf32>
    %cst_34 = arith.constant 9.99999974E-6 : f32
    %89 = vector.broadcast %cst_34 : f32 to vector<16x1xf32>
    %90 = arith.addf %86, %89 : vector<16x1xf32>
    %91 = math.rsqrt %90 : vector<16x1xf32>
    %92 = vector.broadcast %91 : vector<16x1xf32> to vector<16x128xf32>
    %93 = arith.mulf %88, %92 : vector<16x128xf32>
    %c0_35 = arith.constant 0 : index
    %c0_36 = arith.constant 0 : index
    %c0_37 = arith.constant 0 : index
    %94 = vector.load %arg9[%c0_35, %c0_36, %c0_37] : memref<2x1x128xf32, #tpu.memory_space<vmem>>, vector<1x1x128xf32>
    %95 = vector.shape_cast %94 : vector<1x1x128xf32> to vector<1x128xf32>
    %96 = vector.broadcast %95 : vector<1x128xf32> to vector<16x128xf32>
    %97 = arith.mulf %93, %96 : vector<16x128xf32>
    %c0_38 = arith.constant 0 : index
    %c0_39 = arith.constant 0 : index
    %c0_40 = arith.constant 0 : index
    %98 = vector.load %arg10[%c0_38, %c0_39, %c0_40] : memref<2x1x128xf32, #tpu.memory_space<vmem>>, vector<1x1x128xf32>
    %99 = vector.shape_cast %98 : vector<1x1x128xf32> to vector<1x128xf32>
    %100 = vector.broadcast %99 : vector<1x128xf32> to vector<16x128xf32>
    %101 = arith.addf %97, %100 : vector<16x128xf32>
    %102 = arith.truncf %101 : vector<16x128xf32> to vector<16x128xbf16>
    %c1 = arith.constant 1 : index
    %c0_41 = arith.constant 0 : index
    %c0_42 = arith.constant 0 : index
    %103 = vector.load %arg3[%c1, %c0_41, %c0_42] : memref<2x128x768xbf16, #tpu.memory_space<vmem>>, vector<1x128x768xbf16>
    %104 = vector.shape_cast %103 : vector<1x128x768xbf16> to vector<128x768xbf16>
    %cst_43 = arith.constant dense<0.000000e+00> : vector<16x768xf32>
    %105 = tpu.matmul %102, %104, %cst_43 {dimension_numbers = #tpu.dot_dimension_numbers<[1], [0], [0], [1], [0, 0, 1, 1], [], []>} : vector<16x128xbf16>, vector<128x768xbf16>, vector<16x768xf32> -> vector<16x768xf32>
    %c1_44 = arith.constant 1 : index
    %c0_45 = arith.constant 0 : index
    %c0_46 = arith.constant 0 : index
    %106 = vector.load %arg4[%c1_44, %c0_45, %c0_46] : memref<2x1x768xf32, #tpu.memory_space<vmem>>, vector<1x1x768xf32>
    %107 = vector.shape_cast %106 : vector<1x1x768xf32> to vector<1x768xf32>
    %108 = vector.broadcast %107 : vector<1x768xf32> to vector<16x768xf32>
    %109 = arith.addf %105, %108 : vector<16x768xf32>
    %110 = vector.extract_strided_slice %109 {offsets = [0, 0], sizes = [16, 384], strides = [1, 1]} : vector<16x768xf32> to vector<16x384xf32>
    %111 = vector.extract_strided_slice %109 {offsets = [0, 384], sizes = [16, 384], strides = [1, 1]} : vector<16x768xf32> to vector<16x384xf32>
    %c1_i32_47 = arith.constant 1 : i32
    %112 = tpu.dynamic_rotate %110 by %c1_i32_47 dim 0 : vector<16x384xf32>, i32 -> vector<16x384xf32>
    %113 = vector.broadcast %14 : vector<16x1xf32> to vector<16x384xf32>
    %114 = arith.mulf %112, %113 : vector<16x384xf32>
    %c15_i32_48 = arith.constant 15 : i32
    %115 = tpu.dynamic_rotate %110 by %c15_i32_48 dim 0 : vector<16x384xf32>, i32 -> vector<16x384xf32>
    %116 = vector.broadcast %18 : vector<16x1xf32> to vector<16x384xf32>
    %117 = arith.mulf %115, %116 : vector<16x384xf32>
    %c1_49 = arith.constant 1 : index
    %c0_50 = arith.constant 0 : index
    %c0_51 = arith.constant 0 : index
    %118 = vector.load %arg5[%c1_49, %c0_50, %c0_51] : memref<2x3x384xf32, #tpu.memory_space<vmem>>, vector<1x3x384xf32>
    %119 = vector.shape_cast %118 : vector<1x3x384xf32> to vector<3x384xf32>
    %120 = vector.extract_strided_slice %119 {offsets = [0, 0], sizes = [1, 384], strides = [1, 1]} : vector<3x384xf32> to vector<1x384xf32>
    %121 = vector.broadcast %120 : vector<1x384xf32> to vector<16x384xf32>
    %122 = arith.mulf %114, %121 : vector<16x384xf32>
    %123 = vector.extract_strided_slice %119 {offsets = [1, 0], sizes = [1, 384], strides = [1, 1]} : vector<3x384xf32> to vector<1x384xf32>
    %124 = vector.broadcast %123 : vector<1x384xf32> to vector<16x384xf32>
    %125 = arith.mulf %110, %124 : vector<16x384xf32>
    %126 = arith.addf %122, %125 : vector<16x384xf32>
    %127 = vector.extract_strided_slice %119 {offsets = [2, 0], sizes = [1, 384], strides = [1, 1]} : vector<3x384xf32> to vector<1x384xf32>
    %128 = vector.broadcast %127 : vector<1x384xf32> to vector<16x384xf32>
    %129 = arith.mulf %117, %128 : vector<16x384xf32>
    %130 = arith.addf %126, %129 : vector<16x384xf32>
    %c1_52 = arith.constant 1 : index
    %c0_53 = arith.constant 0 : index
    %c0_54 = arith.constant 0 : index
    %131 = vector.load %arg6[%c1_52, %c0_53, %c0_54] : memref<2x1x384xf32, #tpu.memory_space<vmem>>, vector<1x1x384xf32>
    %132 = vector.shape_cast %131 : vector<1x1x384xf32> to vector<1x384xf32>
    %133 = vector.broadcast %132 : vector<1x384xf32> to vector<16x384xf32>
    %134 = arith.addf %130, %133 : vector<16x384xf32>
    %cst_55 = arith.constant 0.000000e+00 : f32
    %135 = vector.broadcast %cst_55 : f32 to vector<16x384xf32>
    %136 = arith.subf %135, %134 : vector<16x384xf32>
    %137 = math.exp %136 : vector<16x384xf32>
    %cst_56 = arith.constant 1.000000e+00 : f32
    %138 = vector.broadcast %cst_56 : f32 to vector<16x384xf32>
    %139 = arith.addf %138, %137 : vector<16x384xf32>
    %140 = tpu.reciprocal %139 {approx = true} : vector<16x384xf32> -> vector<16x384xf32>
    %141 = arith.mulf %134, %140 : vector<16x384xf32>
    %cst_57 = arith.constant 0.000000e+00 : f32
    %142 = vector.broadcast %cst_57 : f32 to vector<16x384xf32>
    %143 = arith.subf %142, %111 : vector<16x384xf32>
    %144 = math.exp %143 : vector<16x384xf32>
    %cst_58 = arith.constant 1.000000e+00 : f32
    %145 = vector.broadcast %cst_58 : f32 to vector<16x384xf32>
    %146 = arith.addf %145, %144 : vector<16x384xf32>
    %147 = tpu.reciprocal %146 {approx = true} : vector<16x384xf32> -> vector<16x384xf32>
    %148 = arith.mulf %111, %147 : vector<16x384xf32>
    %149 = arith.mulf %141, %148 : vector<16x384xf32>
    %150 = arith.truncf %149 : vector<16x384xf32> to vector<16x384xbf16>
    %c1_59 = arith.constant 1 : index
    %c0_60 = arith.constant 0 : index
    %c0_61 = arith.constant 0 : index
    %151 = vector.load %arg7[%c1_59, %c0_60, %c0_61] : memref<2x384x128xbf16, #tpu.memory_space<vmem>>, vector<1x384x128xbf16>
    %152 = vector.shape_cast %151 : vector<1x384x128xbf16> to vector<384x128xbf16>
    %cst_62 = arith.constant dense<0.000000e+00> : vector<16x128xf32>
    %153 = tpu.matmul %150, %152, %cst_62 {dimension_numbers = #tpu.dot_dimension_numbers<[1], [0], [0], [1], [0, 0, 1, 1], [], []>} : vector<16x384xbf16>, vector<384x128xbf16>, vector<16x128xf32> -> vector<16x128xf32>
    %c1_63 = arith.constant 1 : index
    %c0_64 = arith.constant 0 : index
    %c0_65 = arith.constant 0 : index
    %154 = vector.load %arg8[%c1_63, %c0_64, %c0_65] : memref<2x1x128xf32, #tpu.memory_space<vmem>>, vector<1x1x128xf32>
    %155 = vector.shape_cast %154 : vector<1x1x128xf32> to vector<1x128xf32>
    %156 = vector.broadcast %155 : vector<1x128xf32> to vector<16x128xf32>
    %157 = arith.addf %153, %156 : vector<16x128xf32>
    %158 = arith.addf %101, %157 : vector<16x128xf32>
    %cst_66 = arith.constant dense<0.000000e+00> : vector<16xf32>
    %159 = vector.multi_reduction <add>, %158, %cst_66 [1] : vector<16x128xf32> to vector<16xf32>
    %160 = vector.shape_cast %159 : vector<16xf32> to vector<16x1xf32>
    %cst_67 = arith.constant 1.280000e+02 : f32
    %161 = vector.broadcast %cst_67 : f32 to vector<16x1xf32>
    %162 = arith.divf %160, %161 : vector<16x1xf32>
    %163 = vector.broadcast %162 : vector<16x1xf32> to vector<16x128xf32>
    %164 = arith.subf %158, %163 : vector<16x128xf32>
    %165 = arith.mulf %164, %164 : vector<16x128xf32>
    %cst_68 = arith.constant dense<0.000000e+00> : vector<16xf32>
    %166 = vector.multi_reduction <add>, %165, %cst_68 [1] : vector<16x128xf32> to vector<16xf32>
    %167 = vector.shape_cast %166 : vector<16xf32> to vector<16x1xf32>
    %cst_69 = arith.constant 1.280000e+02 : f32
    %168 = vector.broadcast %cst_69 : f32 to vector<16x1xf32>
    %169 = arith.divf %167, %168 : vector<16x1xf32>
    %170 = vector.broadcast %162 : vector<16x1xf32> to vector<16x128xf32>
    %171 = arith.subf %158, %170 : vector<16x128xf32>
    %cst_70 = arith.constant 9.99999974E-6 : f32
    %172 = vector.broadcast %cst_70 : f32 to vector<16x1xf32>
    %173 = arith.addf %169, %172 : vector<16x1xf32>
    %174 = math.rsqrt %173 : vector<16x1xf32>
    %175 = vector.broadcast %174 : vector<16x1xf32> to vector<16x128xf32>
    %176 = arith.mulf %171, %175 : vector<16x128xf32>
    %c1_71 = arith.constant 1 : index
    %c0_72 = arith.constant 0 : index
    %c0_73 = arith.constant 0 : index
    %177 = vector.load %arg9[%c1_71, %c0_72, %c0_73] : memref<2x1x128xf32, #tpu.memory_space<vmem>>, vector<1x1x128xf32>
    %178 = vector.shape_cast %177 : vector<1x1x128xf32> to vector<1x128xf32>
    %179 = vector.broadcast %178 : vector<1x128xf32> to vector<16x128xf32>
    %180 = arith.mulf %176, %179 : vector<16x128xf32>
    %c1_74 = arith.constant 1 : index
    %c0_75 = arith.constant 0 : index
    %c0_76 = arith.constant 0 : index
    %181 = vector.load %arg10[%c1_74, %c0_75, %c0_76] : memref<2x1x128xf32, #tpu.memory_space<vmem>>, vector<1x1x128xf32>
    %182 = vector.shape_cast %181 : vector<1x1x128xf32> to vector<1x128xf32>
    %183 = vector.broadcast %182 : vector<1x128xf32> to vector<16x128xf32>
    %184 = arith.addf %180, %183 : vector<16x128xf32>
    %cst_77 = arith.constant dense<0.000000e+00> : vector<128xf32>
    %185 = vector.multi_reduction <add>, %184, %cst_77 [0] : vector<16x128xf32> to vector<128xf32>
    %186 = vector.shape_cast %185 : vector<128xf32> to vector<1x128xf32>
    %cst_78 = arith.constant 6.250000e-02 : f32
    %187 = vector.broadcast %cst_78 : f32 to vector<1x128xf32>
    %188 = arith.mulf %186, %187 : vector<1x128xf32>
    %189 = arith.truncf %188 : vector<1x128xf32> to vector<1x128xbf16>
    %c0_79 = arith.constant 0 : index
    %c0_80 = arith.constant 0 : index
    %190 = vector.load %arg11[%c0_79, %c0_80] : memref<128x384xbf16, #tpu.memory_space<vmem>>, vector<128x384xbf16>
    %cst_81 = arith.constant dense<0.000000e+00> : vector<1x384xf32>
    %191 = tpu.matmul %189, %190, %cst_81 {dimension_numbers = #tpu.dot_dimension_numbers<[1], [0], [0], [1], [0, 0, 1, 1], [], []>} : vector<1x128xbf16>, vector<128x384xbf16>, vector<1x384xf32> -> vector<1x384xf32>
    %c0_82 = arith.constant 0 : index
    %c0_83 = arith.constant 0 : index
    %192 = vector.load %arg12[%c0_82, %c0_83] : memref<1x384xf32, #tpu.memory_space<vmem>>, vector<1x384xf32>
    %193 = arith.addf %191, %192 : vector<1x384xf32>
    %cst_84 = arith.constant 0.000000e+00 : f32
    %194 = vector.broadcast %cst_84 : f32 to vector<1x384xf32>
    %195 = arith.maximumf %193, %194 : vector<1x384xf32>
    %196 = arith.truncf %195 : vector<1x384xf32> to vector<1x384xbf16>
    %c0_85 = arith.constant 0 : index
    %c0_86 = arith.constant 0 : index
    %197 = vector.load %arg13[%c0_85, %c0_86] : memref<384x2xbf16, #tpu.memory_space<vmem>>, vector<384x2xbf16>
    %cst_87 = arith.constant dense<0.000000e+00> : vector<1x2xf32>
    %198 = tpu.matmul %196, %197, %cst_87 {dimension_numbers = #tpu.dot_dimension_numbers<[1], [0], [0], [1], [0, 0, 1, 1], [], []>} : vector<1x384xbf16>, vector<384x2xbf16>, vector<1x2xf32> -> vector<1x2xf32>
    %c0_88 = arith.constant 0 : index
    %c0_89 = arith.constant 0 : index
    %199 = vector.load %arg14[%c0_88, %c0_89] : memref<1x2xf32, #tpu.memory_space<vmem>>, vector<1x2xf32>
    %200 = arith.addf %198, %199 : vector<1x2xf32>
    %c0_90 = arith.constant 0 : index
    %c0_91 = arith.constant 0 : index
    %c0_92 = arith.constant 0 : index
    %201 = vector.load %arg15[%c0_90, %c0_91, %c0_92] : memref<1x1x2xf32, #tpu.memory_space<vmem>>, vector<1x1x2xf32>
    %202 = vector.shape_cast %201 : vector<1x1x2xf32> to vector<1x2xf32>
    %203 = vector.shape_cast %200 : vector<1x2xf32> to vector<1x1x2xf32>
    tpu.vector_store %arg15[%c0_90, %c0_91, %c0_92], %203 {strides = array<i32>} : memref<1x1x2xf32, #tpu.memory_space<vmem>>, vector<1x1x2xf32>,
    return
  }
  func.func @transform_0(%arg0: i32) -> (i32, i32) {
    %c0_i32 = arith.constant 0 : i32
    %c0_i32_0 = arith.constant 0 : i32
    return %arg0, %c0_i32 : i32, i32
  }
  func.func @transform_1(%arg0: i32) -> (i32, i32) {
    %c0_i32 = arith.constant 0 : i32
    %c0_i32_0 = arith.constant 0 : i32
    %c0_i32_1 = arith.constant 0 : i32
    return %c0_i32, %c0_i32_0 : i32, i32
  }
  func.func @transform_2(%arg0: i32) -> (i32, i32, i32) {
    %c0_i32 = arith.constant 0 : i32
    %c0_i32_0 = arith.constant 0 : i32
    %c0_i32_1 = arith.constant 0 : i32
    %c0_i32_2 = arith.constant 0 : i32
    return %c0_i32, %c0_i32_0, %c0_i32_1 : i32, i32, i32
  }
  func.func @transform_3(%arg0: i32) -> (i32, i32, i32) {
    %c0_i32 = arith.constant 0 : i32
    %c0_i32_0 = arith.constant 0 : i32
    %c0_i32_1 = arith.constant 0 : i32
    %c0_i32_2 = arith.constant 0 : i32
    return %c0_i32, %c0_i32_0, %c0_i32_1 : i32, i32, i32
  }
  func.func @transform_4(%arg0: i32) -> (i32, i32, i32) {
    %c0_i32 = arith.constant 0 : i32
    %c0_i32_0 = arith.constant 0 : i32
    %c0_i32_1 = arith.constant 0 : i32
    %c0_i32_2 = arith.constant 0 : i32
    return %c0_i32, %c0_i32_0, %c0_i32_1 : i32, i32, i32
  }
  func.func @transform_5(%arg0: i32) -> (i32, i32, i32) {
    %c0_i32 = arith.constant 0 : i32
    %c0_i32_0 = arith.constant 0 : i32
    %c0_i32_1 = arith.constant 0 : i32
    %c0_i32_2 = arith.constant 0 : i32
    return %c0_i32, %c0_i32_0, %c0_i32_1 : i32, i32, i32
  }
  func.func @transform_6(%arg0: i32) -> (i32, i32, i32) {
    %c0_i32 = arith.constant 0 : i32
    %c0_i32_0 = arith.constant 0 : i32
    %c0_i32_1 = arith.constant 0 : i32
    %c0_i32_2 = arith.constant 0 : i32
    return %c0_i32, %c0_i32_0, %c0_i32_1 : i32, i32, i32
  }
  func.func @transform_7(%arg0: i32) -> (i32, i32, i32) {
    %c0_i32 = arith.constant 0 : i32
    %c0_i32_0 = arith.constant 0 : i32
    %c0_i32_1 = arith.constant 0 : i32
    %c0_i32_2 = arith.constant 0 : i32
    return %c0_i32, %c0_i32_0, %c0_i32_1 : i32, i32, i32
  }
  func.func @transform_8(%arg0: i32) -> (i32, i32, i32) {
    %c0_i32 = arith.constant 0 : i32
    %c0_i32_0 = arith.constant 0 : i32
    %c0_i32_1 = arith.constant 0 : i32
    %c0_i32_2 = arith.constant 0 : i32
    return %c0_i32, %c0_i32_0, %c0_i32_1 : i32, i32, i32
  }
  func.func @transform_9(%arg0: i32) -> (i32, i32, i32) {
    %c0_i32 = arith.constant 0 : i32
    %c0_i32_0 = arith.constant 0 : i32
    %c0_i32_1 = arith.constant 0 : i32
    %c0_i32_2 = arith.constant 0 : i32
    return %c0_i32, %c0_i32_0, %c0_i32_1 : i32, i32, i32
  }
  func.func @transform_10(%arg0: i32) -> (i32, i32) {
    %c0_i32 = arith.constant 0 : i32
    %c0_i32_0 = arith.constant 0 : i32
    %c0_i32_1 = arith.constant 0 : i32
    return %c0_i32, %c0_i32_0 : i32, i32
  }
  func.func @transform_11(%arg0: i32) -> (i32, i32) {
    %c0_i32 = arith.constant 0 : i32
    %c0_i32_0 = arith.constant 0 : i32
    %c0_i32_1 = arith.constant 0 : i32
    return %c0_i32, %c0_i32_0 : i32, i32
  }
  func.func @transform_12(%arg0: i32) -> (i32, i32) {
    %c0_i32 = arith.constant 0 : i32
    %c0_i32_0 = arith.constant 0 : i32
    %c0_i32_1 = arith.constant 0 : i32
    return %c0_i32, %c0_i32_0 : i32, i32
  }
  func.func @transform_13(%arg0: i32) -> (i32, i32) {
    %c0_i32 = arith.constant 0 : i32
    %c0_i32_0 = arith.constant 0 : i32
    %c0_i32_1 = arith.constant 0 : i32
    return %c0_i32, %c0_i32_0 : i32, i32
  }
  func.func @transform_14(%arg0: i32) -> (i32, i32, i32) {
    %c0_i32 = arith.constant 0 : i32
    %c0_i32_0 = arith.constant 0 : i32
    %c0_i32_1 = arith.constant 0 : i32
    return %arg0, %c0_i32, %c0_i32_0 : i32, i32, i32
  }
}

</mosaic_0001>

<bundles_post_ra>
// kernel: model_forward.1
= control target key start
LH: loop header
LB: loop body
LE: loop exit
PB: predicated region body
PF: predicated region fallthrough
CT: control target
= control target key end

     0   :  { %s5057_s0 = inlined_call_operand.vmem [shape: s32[32,1], index: 0, kind: input, shape index: {}]   ;;  %s5058_s1 = inlined_call_operand.vmem [shape: bf16[8,128], index: 1, kind: input, shape index: {}]   ;;  %s5059_s2 = inlined_call_operand.hbm [shape: bf16[2,128,768], index: 2, kind: input, shape index: {}]   ;;  %s5060_s3 = inlined_call_operand.vmem [shape: f32[2,1,768], index: 3, kind: input, shape index: {}]   ;;  %s5061_s4 = inlined_call_operand.vmem [shape: f32[2,3,384], index: 4, kind: input, shape index: {}]   ;;  %s5062_s5 = inlined_call_operand.vmem [shape: f32[2,1,384], index: 5, kind: input, shape index: {}]   ;;  %s5063_s6 = inlined_call_operand.hbm [shape: bf16[2,384,128], index: 6, kind: input, shape index: {}]   ;;  %s5064_s7 = inlined_call_operand.vmem [shape: f32[2,1,128], index: 7, kind: input, shape index: {}]   ;;  %s5065_s8 = inlined_call_operand.vmem [shape: f32[2,1,128], index: 8, kind: input, shape index: {}]   ;;  %s5066_s9 = inlined_call_operand.vmem [shape: f32[2,1,128], index: 9, kind: input, shape index: {}]   ;;  %s5067_s10 = inlined_call_operand.vmem [shape: bf16[128,384], index: 10, kind: input, shape index: {}]   ;;  %s5068_s11 = inlined_call_operand.vmem [shape: f32[1,384], index: 11, kind: input, shape index: {}]   ;;  %s5069_s12 = inlined_call_operand.vmem [shape: bf16[384,2], index: 12, kind: input, shape index: {}]   ;;  %s5070_s13 = inlined_call_operand.vmem [shape: f32[1,2], index: 13, kind: input, shape index: {}]   ;;  %s5071_s14 = inlined_call_operand.hbm [shape: f32[2,1,2], index: 14, kind: output, shape index: {}]  }
   0x1   :  { %5077 = sst [smem:[#allocation16_spill]] %s5059_s2 }
   0x2   :  { %19 = vsyncpa [#allocation3], 0 }
   0x3   :  { %20 = vsyncpa [#allocation6], 0 }
   0x4   :  { %21 = vsyncpa [#allocation4], 0 }
   0x5   :  { %23 = vsyncpa [#allocation4 + $0x1], 0  ;;  %s4238_s29 = smov 0   ;;  %s4240_s30 = smov 0  }
   0x6   :  { %s4242_s15 = smov 0   ;;  %s4244_s16 = smov 0  }
   0x7 LB: > { %5078 = sst [smem:[#allocation11_spill]] %s4140_s29  ;;  %s4259_s17 = sadd.s32 4294967295, %s4152_s16   ;;  %s4152_s16 = sphi %s4244_s16, %s5089_s16   ;;  %s4148_s15 = sphi %s4242_s15, %s5091_s15   ;;  %s4144_s30 = sphi %s4240_s30, %s5093_s30   ;;  %s4140_s29 = sphi %s4238_s29, %s5092_s29  }
   0x8   : > { %5079 = sst [smem:[#allocation12_spill]] %s4148_s15  ;;  %s2860_s18 = sadd.s32 4294967294, %s4152_s16  }
   0x9   : > { %s4263_s19 = sadd.s32 1, %s4152_s16   ;;  %s335_s20 = sadd.s32 1, %s4148_s15 }
   0xa   : > { %5080 = sst [smem:[#allocation13_spill]] %s4263_s19  ;;  %s332_s21 = ssub.s32 %s4152_s16, %s4263_s19 }
   0xb   : > { %p345_p0 = scmp.ne.s32.totalorder %s4148_s15, %s4144_s30  ;;  %p333_p1 = scmp.eq.s32.totalorder %s332_s21, 0 }
   0xc   : > { %p346_p2 = scmp.eq.s32.totalorder %s4259_s17, 1  ;;  %p351_p3 = scmp.ne.s32.totalorder %s4144_s30, %s4140_s29 }
   0xd   : > { %p352_p4 = scmp.eq.s32.totalorder %s2860_s18, 1  ;;  %p2861_p7 = scmp.ge.s32.totalorder %s4152_s16, 1 }
   0xe   : > { %s4274_s22 = scalar_select %p333_p1, %s4148_s15, %s335_s20  }
   0xf   : > { %p4276_p5 = por %p346_p2, %p345_p0  ;;  %p4280_p6 = por %p352_p4, %p351_p3 }
  0x10   : > { %5081 = sst [smem:[#allocation14_spill]] %s4274_s22  ;;  %p359_p8 = scmp.lt.s32.totalorder %s4152_s16, 3 }
  0x11   : > { %s5083_s24 = scalar_select %p4280_p6, 1, 0 }
  0x12   : > { %p3863_p9 = scmp.eq.s32.totalorder %s4259_s17, 0  ;;  %p4287_p10 = pnand %p2861_p7, %p359_p8 }
  0x13   : > { %5084 = sst [smem:[#allocation15_spill]] %s5083_s24  ;;  %s4154_s18 = smov [#allocation2]  }
  0x14   : > { %s5086_s2 = sld [smem:[#allocation16_spill]]  ;;  %p3852_p11 = pneg %p4287_p10 }
  0x15   : > { %s375_s20 = sshll.u32 %s4154_s18, 4  ;;  %s396_s15 = sshll.u32 %s5063_s6, 4  ;;  %s376_s20 = int_to_ptr.vmem [resolvable:$true] %s375_s20  ;;  %s397_s15 = int_to_ptr.hbm [resolvable:$true] %s396_s15 }
  0x16   : > { %p3853_p12 = pnand %p3863_p9, %p3852_p11  ;;  %s4155_s19 = smov 384  }
  0x17   : > { %s4156_s24 = smov 24   ;;  %s4157_s29 = smov [#allocation5]  }
  0x18   : > { %s398_s26 = sshll.u32 %s4157_s29, 4  ;;  %s4158_s27 = smov 64   ;;  %s399_s26 = int_to_ptr.vmem [resolvable:$true] %s398_s26 }
  0x19   : > { %444 = sbr.rel (%p4287_p10) target bundleno = 1812 (0x714), region = 76 }
  0x1a   : > { %s373_s28 = sshll.u32 %s5086_s2, 4  ;;  %s4159_s2 = smov 4   ;;  %s374_s28 = int_to_ptr.hbm [resolvable:$true] %s373_s28 }
  0x1b   : > { %3855 = dma.hbm_to_vmem [thread:$0]  (!%p3853_p12), %s374_s28, 12288, %s376_s20, [#allocation3], %s4155_s19, %s4155_s19, %s4156_s24  }
  0x1c   : > { %3858 = dma.hbm_to_vmem [thread:$0]  (!%p3853_p12), %s397_s15, 6144, %s399_s26, [#allocation6], %s4158_s27, %s4158_s27, %s4159_s2  }
  0x1e   : > { %4127 = dma.done.wait (%p3863_p9), [#allocation3], 12288  }
  0x1f   : > { %4129 = vsyncadd (%p3863_p9), [#allocation3], 4294955008 }
  0x20   : > { %4131 = dma.done.wait (%p3863_p9), [#allocation6], 6144  }
  0x21   : > { %4133 = vsyncadd (%p3863_p9), [#allocation6], 4294961152  ;;  %s2868_s29 = sshll.u32 %s4259_s17, 1  ;;  %v4160_v0 = vmov 0   ;;  %v517_v3 = vld [vmem:[%s5058_s1] sm:$0xf] }
  0x22   : > { %3909 = vset.pattern.permute.xlu0 %v4160_v0  ;;  %p496_p13 = scmp.lt.s32.totalorder %s2868_s29, 3  ;;  %vm522_vm0 = vcmask 1043456   ;;  %v3043_v5 = vld [vmem:[#allocation2 + $0x150] sm:$0xf]  ;;  %v3695_v6 = vld [vmem:[#allocation2 + $0x164] sm:$0xf0] }
  0x23   : > { %v524_v4 = vsel %vm522_vm0, %v517_v3, 0  ;;  %v3692_v7 = vld [vmem:[#allocation2 + $0x154] sm:$0xf]  ;;  %v3044_v8 = vor.u32 %v3695_v6, %v3043_v5  ;;  %v3045_v9 = vld [vmem:[#allocation2 + $0x168] sm:$0xf0]  ;;  %vm518_vm3 = vcmask 64512  }
  0x24   : > { %s5095_s29 = smov (!%p496_p13, %s2868_s29), 3  ;;  %533 = vmatpush.bf16.msra.mxu0 %v524_v4  ;;  %v3019_v10 = vld [vmem:[#allocation2 + $0x120] sm:$0xf]  ;;  %v3689_v11 = vld [vmem:[#allocation2 + $0x134] sm:$0xf0]  ;;  %v3048_v12 = vor.u32 %v3692_v7, %v3045_v9  ;;  %s493_s27 = sand.u32 1, %s4144_s30  }
  0x25   : > { %s2869_s2 = sshll.u32 %s5095_s29, 3  ;;  %v3686_v13 = vld [vmem:[#allocation2 + $0x124] sm:$0xf]  ;;  %v3021_v14 = vld [vmem:[#allocation2 + $0x138] sm:$0xf0]  ;;  %858 = vmatpush.bf16.msra.mxu1 %v3044_v8  ;;  %v3020_v15 = vor.u32 %v3689_v11, %v3019_v10  ;;  %s494_s24 = scalar_lea.vmem [#allocation7], %s493_s27 }
  0x26   : > { %s499_s22 = scalar_lea.vmem %s5057_s0, %s2869_s2  ;;  %872 = vmatpush.bf16.msra.mxu2 %v3048_v12  ;;  %v3024_v16 = vor.u32 %v3686_v13, %v3021_v14  ;;  %v2995_v17 = vld [vmem:[#allocation2 + $0xf0] sm:$0xf]  ;;  %v3683_v18 = vld [vmem:[#allocation2 + $0x104] sm:$0xf0]  ;;  %v3680_v19 = vld [vmem:[#allocation2 + $0xf4] sm:$0xf] }
  0x27   : > { %v502_v1 = vld [vmem:[%s499_s22] sm:$0xff]  ;;  %v503_v2 = vld [vmem:[%s499_s22 + $0x8] sm:$0xff]  ;;  %v3051_v21 = vld [vmem:[#allocation2 + $0x158] sm:$0xf]  ;;  %v2996_v26 = vor.u32 %v3683_v18, %v2995_v17  ;;  %s2779_s22 = scalar_lea.hbm %s5071_s14, %s4259_s17  ;;  %s2781_s25 = sshll.u32 %s494_s24, 4  ;;  %s2782_s25 = int_to_ptr.vmem [resolvable:$true] %s2781_s25 }
  0x28   : > { %507 = vperm.xlu0 %3909, %v502_v1   ;;  %v2997_v20 = vld [vmem:[#allocation2 + $0x108] sm:$0xf0]  ;;  %v3696_v22 = vld [vmem:[#allocation2 + $0x16c] sm:$0xf0]  ;;  %v3693_v24 = vld [vmem:[#allocation2 + $0x15c] sm:$0xf]  ;;  %v504_v1 = vlaneseq }
  0x29   : > { %v3052_v23 = vor.u32 %v3696_v22, %v3051_v21  ;;  %v3053_v25 = vld [vmem:[#allocation2 + $0x170] sm:$0xf0]  ;;  %859 = vmatpush.bf16.msra.mxu1 %v3020_v15  ;;  %v2971_v27 = vld [vmem:[#allocation2 + $0xc0] sm:$0xf]  ;;  %v3677_v28 = vld [vmem:[#allocation2 + $0xd4] sm:$0xf0]  ;;  %v3000_v30 = vor.u32 %v3680_v19, %v2997_v20 }
  0x2a   : > { %v3056_v29 = vor.u32 %v3693_v24, %v3053_v25  ;;  %873 = vmatpush.bf16.msra.mxu2 %v3024_v16  ;;  %v3027_v31 = vld [vmem:[#allocation2 + $0x128] sm:$0xf]  ;;  %v3690_v32 = vld [vmem:[#allocation2 + $0x13c] sm:$0xf0]  ;;  %v3687_v33 = vld [vmem:[#allocation2 + $0x12c] sm:$0xf]  ;;  %v2972_v40 = vor.u32 %v3677_v28, %v2971_v27 }
  0x2b   : > { %886 = vmatpush.bf16.msra.mxu3 %v3052_v23  ;;  %v3674_v34 = vld [vmem:[#allocation2 + $0xc4] sm:$0xf]  ;;  %v2973_v35 = vld [vmem:[#allocation2 + $0xd8] sm:$0xf0]  ;;  %v3028_v36 = vor.u32 %v3690_v32, %v3027_v31  ;;  %v3003_v39 = vld [vmem:[#allocation2 + $0xf8] sm:$0xf] }
  0x2c   : > { %900 = vmatpush.bf16.msrb.mxu0 %v3056_v29  ;;  %v3029_v37 = vld [vmem:[#allocation2 + $0x140] sm:$0xf0]  ;;  %v3684_v41 = vld [vmem:[#allocation2 + $0x10c] sm:$0xf0]  ;;  %v3681_v42 = vld [vmem:[#allocation2 + $0xfc] sm:$0xf]  ;;  %v2976_v44 = vor.u32 %v3674_v34, %v2973_v35 }
  0x2d   : > { %v3032_v38 = vor.u32 %v3687_v33, %v3029_v37  ;;  %860 = vmatpush.bf16.msra.mxu1 %v2996_v26  ;;  %v3005_v43 = vld [vmem:[#allocation2 + $0x110] sm:$0xf0]  ;;  %v2947_v45 = vld [vmem:[#allocation2 + $0x90] sm:$0xf]  ;;  %v3671_v46 = vld [vmem:[#allocation2 + $0xa4] sm:$0xf0]  ;;  %v3004_v48 = vor.u32 %v3684_v41, %v3003_v39 }
  0x2e   : > { %874 = vmatpush.bf16.msra.mxu2 %v3000_v30  ;;  %v3668_v47 = vld [vmem:[#allocation2 + $0x94] sm:$0xf]  ;;  %v2949_v49 = vld [vmem:[#allocation2 + $0xa8] sm:$0xf0]  ;;  %v3008_v50 = vor.u32 %v3681_v42, %v3005_v43  ;;  %v2979_v51 = vld [vmem:[#allocation2 + $0xc8] sm:$0xf]  ;;  %v2948_v55 = vor.u32 %v3671_v46, %v2947_v45 }
  0x2f   : > { %887 = vmatpush.bf16.msra.mxu3 %v3028_v36  ;;  %v3678_v52 = vld [vmem:[#allocation2 + $0xdc] sm:$0xf0]  ;;  %v3675_v53 = vld [vmem:[#allocation2 + $0xcc] sm:$0xf]  ;;  %v2981_v54 = vld [vmem:[#allocation2 + $0xe0] sm:$0xf0]  ;;  %v2952_v56 = vor.u32 %v3668_v47, %v2949_v49 }
  0x30   : > { %510 = vperm.xlu0 %3909, %v503_v2   ;;  %901 = vmatpush.bf16.msrb.mxu0 %v3032_v38  ;;  %v2923_v57 = vld [vmem:[#allocation2 + $0x60] sm:$0xf]  ;;  %v3665_v58 = vld [vmem:[#allocation2 + $0x74] sm:$0xf0]  ;;  %v3662_v59 = vld [vmem:[#allocation2 + $0x64] sm:$0xf]  ;;  %v2980_v60 = vor.u32 %v3678_v52, %v2979_v51  ;;  %v2984_v62 = vor.u32 %v3675_v53, %v2981_v54 }
  0x31   : > { %861 = vmatpush.bf16.msra.mxu1 %v2972_v40  ;;  %v2925_v61 = vld [vmem:[#allocation2 + $0x78] sm:$0xf0]  ;;  %v2955_v63 = vld [vmem:[#allocation2 + $0x98] sm:$0xf]  ;;  %v3672_v0 = vld [vmem:[#allocation2 + $0xac] sm:$0xf0]  ;;  %v2924_v5 = vor.u32 %v3665_v58, %v2923_v57 }
  0x32   : > { %875 = vmatpush.bf16.msra.mxu2 %v2976_v44  ;;  %v3669_v2 = vld [vmem:[#allocation2 + $0x9c] sm:$0xf]  ;;  %v2957_v3 = vld [vmem:[#allocation2 + $0xb0] sm:$0xf0]  ;;  %v2928_v6 = vor.u32 %v3662_v59, %v2925_v61  ;;  %v2899_v7 = vld [vmem:[#allocation2 + $0x30] sm:$0xf]  ;;  %v2956_v9 = vor.u32 %v3672_v0, %v2955_v63 }
  0x33   : > { %888 = vmatpush.bf16.msra.mxu3 %v3004_v48  ;;  %v3659_v8 = vld [vmem:[#allocation2 + $0x44] sm:$0xf0]  ;;  %v3656_v10 = vld [vmem:[#allocation2 + $0x34] sm:$0xf]  ;;  %v2901_v11 = vld [vmem:[#allocation2 + $0x48] sm:$0xf0]  ;;  %v2960_v12 = vor.u32 %v3669_v2, %v2957_v3 }
  0x34   : > { %902 = vmatpush.bf16.msrb.mxu0 %v3008_v50  ;;  %v505_v13 = vand.u32 127, %v504_v1  ;;  %v2900_v14 = vor.u32 %v3659_v8, %v2899_v7  ;;  %v2904_v15 = vor.u32 %v3656_v10, %v2901_v11  ;;  %v2875_v16 = vld [vmem:[#allocation2] sm:$0xf]  ;;  %v3653_v17 = vld [vmem:[#allocation2 + $0x14] sm:$0xf0]  ;;  %v4161_v27 = vmov 0.0  }
  0x35   : > { %862 = vmatpush.bf16.msra.mxu1 %v2948_v55  ;;  %v3650_v18 = vld [vmem:[#allocation2 + $0x4] sm:$0xf]  ;;  %v2877_v19 = vld [vmem:[#allocation2 + $0x18] sm:$0xf0]  ;;  %v3059_v20 = vld [vmem:[#allocation2 + $0x160] sm:$0xf]  ;;  %v2876_v25 = vor.u32 %v3653_v17, %v2875_v16 }
  0x36   : > { %876 = vmatpush.bf16.msra.mxu2 %v2952_v56  ;;  %v3697_v21 = vld [vmem:[#allocation2 + $0x174] sm:$0xf0]  ;;  %v3694_v22 = vld [vmem:[#allocation2 + $0x164] sm:$0xf]  ;;  %v3061_v23 = vld [vmem:[#allocation2 + $0x178] sm:$0xf0]  ;;  %v2880_v26 = vor.u32 %v3650_v18, %v2877_v19 }
  0x37   : > { %889 = vmatpush.bf16.msra.mxu3 %v2980_v60  ;;  %v3060_v30 = vor.u32 %v3697_v21, %v3059_v20  ;;  %v3064_v31 = vor.u32 %v3694_v22, %v3061_v23  ;;  %v2931_v33 = vld [vmem:[#allocation2 + $0x68] sm:$0xf]  ;;  %v3666_v34 = vld [vmem:[#allocation2 + $0x7c] sm:$0xf0]  ;;  %v3663_v35 = vld [vmem:[#allocation2 + $0x6c] sm:$0xf] }
  0x38   : > { %903 = vmatpush.bf16.msrb.mxu0 %v2984_v62  ;;  %v2932_v36 = vor.u32 %v3666_v34, %v2931_v33  ;;  %v2933_v37 = vld [vmem:[#allocation2 + $0x80] sm:$0xf0]  ;;  %v3035_v38 = vld [vmem:[#allocation2 + $0x130] sm:$0xf]  ;;  %v3691_v39 = vld [vmem:[#allocation2 + $0x144] sm:$0xf0] }
  0x39   : > { %863 = vmatpush.bf16.msra.mxu1 %v2924_v5  ;;  %v2936_v40 = vor.u32 %v3663_v35, %v2933_v37  ;;  %v3036_v41 = vor.u32 %v3691_v39, %v3035_v38  ;;  %v3688_v42 = vld [vmem:[#allocation2 + $0x134] sm:$0xf]  ;;  %v3037_v43 = vld [vmem:[#allocation2 + $0x148] sm:$0xf0]  ;;  %v2907_v45 = vld [vmem:[#allocation2 + $0x38] sm:$0xf] }
  0x3a   : > { %877 = vmatpush.bf16.msra.mxu2 %v2928_v6  ;;  %v3040_v44 = vor.u32 %v3688_v42, %v3037_v43  ;;  %v3660_v46 = vld [vmem:[#allocation2 + $0x4c] sm:$0xf0]  ;;  %v3657_v47 = vld [vmem:[#allocation2 + $0x3c] sm:$0xf]  ;;  %v2909_v49 = vld [vmem:[#allocation2 + $0x50] sm:$0xf0] }
  0x3b   : > { %890 = vmatpush.bf16.msra.mxu3 %v2956_v9  ;;  %v2908_v48 = vor.u32 %v3660_v46, %v2907_v45  ;;  %v3011_v50 = vld [vmem:[#allocation2 + $0x100] sm:$0xf]  ;;  %v3685_v51 = vld [vmem:[#allocation2 + $0x114] sm:$0xf0]  ;;  %v2912_v52 = vor.u32 %v3657_v47, %v2909_v49  ;;  %v3682_v54 = vld [vmem:[#allocation2 + $0x104] sm:$0xf] }
  0x3c   : > { %904 = vmatpush.bf16.msrb.mxu0 %v2960_v12  ;;  %v3012_v53 = vor.u32 %v3685_v51, %v3011_v50  ;;  %v3013_v55 = vld [vmem:[#allocation2 + $0x118] sm:$0xf0]  ;;  %v2883_v57 = vld [vmem:[#allocation2 + $0x8] sm:$0xf]  ;;  %v3654_v58 = vld [vmem:[#allocation2 + $0x1c] sm:$0xf0] }
  0x3d   : > { %864 = vmatpush.bf16.msra.mxu1 %v2900_v14  ;;  %v3016_v56 = vor.u32 %v3682_v54, %v3013_v55  ;;  %v3651_v59 = vld [vmem:[#allocation2 + $0xc] sm:$0xf]  ;;  %v2884_v60 = vor.u32 %v3654_v58, %v2883_v57  ;;  %v2885_v61 = vld [vmem:[#allocation2 + $0x20] sm:$0xf0]  ;;  %v2987_v62 = vld [vmem:[#allocation2 + $0xd0] sm:$0xf] }
  0x3e   : > { %878 = vmatpush.bf16.msra.mxu2 %v2904_v15  ;;  %v3679_v63 = vld [vmem:[#allocation2 + $0xe4] sm:$0xf0]  ;;  %v2888_v0 = vor.u32 %v3651_v59, %v2885_v61  ;;  %v3676_v3 = vld [vmem:[#allocation2 + $0xd4] sm:$0xf]  ;;  %v2963_v6 = vld [vmem:[#allocation2 + $0xa0] sm:$0xf] }
  0x3f   : > { %891 = vmatpush.bf16.msra.mxu3 %v2932_v36  ;;  %v2988_v2 = vor.u32 %v3679_v63, %v2987_v62  ;;  %v3673_v7 = vld [vmem:[#allocation2 + $0xb4] sm:$0xf0]  ;;  %v3670_v8 = vld [vmem:[#allocation2 + $0xa4] sm:$0xf]  ;;  %v2965_v10 = vld [vmem:[#allocation2 + $0xb8] sm:$0xf0] }
  0x40   : > { %905 = vmatpush.bf16.msrb.mxu0 %v2936_v40  ;;  %v2964_v9 = vor.u32 %v3673_v7, %v2963_v6  ;;  %v2968_v11 = vor.u32 %v3670_v8, %v2965_v10  ;;  %v2939_v12 = vld [vmem:[#allocation2 + $0x70] sm:$0xf]  ;;  %v3664_v14 = vld [vmem:[#allocation2 + $0x74] sm:$0xf]  ;;  %v2941_v16 = vld [vmem:[#allocation2 + $0x88] sm:$0xf0] }
  0x41   : > { %865 = vmatpush.bf16.msra.mxu1 %v2876_v25  ;;  %v2944_v17 = vor.u32 %v3664_v14, %v2941_v16  ;;  %v2915_v18 = vld [vmem:[#allocation2 + $0x40] sm:$0xf]  ;;  %v3661_v19 = vld [vmem:[#allocation2 + $0x54] sm:$0xf0]  ;;  %v3658_v20 = vld [vmem:[#allocation2 + $0x44] sm:$0xf] }
  0x42   : > { %879 = vmatpush.bf16.msra.mxu2 %v2880_v26  ;;  %v2917_v21 = vld [vmem:[#allocation2 + $0x58] sm:$0xf0]  ;;  %v2916_v22 = vor.u32 %v3661_v19, %v2915_v18  ;;  %v3655_v25 = vld [vmem:[#allocation2 + $0x24] sm:$0xf0]  ;;  %v3652_v26 = vld [vmem:[#allocation2 + $0x14] sm:$0xf] }
  0x43   : > { %892 = vmatpush.bf16.msra.mxu3 %v2908_v48  ;;  %v2920_v23 = vor.u32 %v3658_v20, %v2917_v21  ;;  %v4328_v34 = vshrl.u32 %v504_v1, 7  ;;  %v3705_v35 = vld [vmem:[#allocation5 + $0x38] sm:$0xff]  ;;  %v4333_v36 = vld [vmem:[%s5060_s3] sm:$0x3f]  ;;  %v3704_v39 = vld [vmem:[#allocation5 + $0x30] sm:$0xff]  ;;  %s2783_s28 = sshll.u32 %s2779_s22, 4  ;;  %s2784_s28 = int_to_ptr.hbm [resolvable:$true] %s2783_s28 }
  0x44   : > { %906 = vmatpush.bf16.msrb.mxu0 %v2912_v52  ;;  %v609_v38 = vperm.slane %v4333_v36, 3  ;;  %v980_v40 = vld [vmem:[%s5061_s4] sm:$0x77]  ;;  %v981_v1 = vld [vmem:[%s5061_s4 + $0x8] sm:$0x7]  ;;  %v3713_v42 = vld [vmem:[#allocation5 + $0x78] sm:$0xff] }
  0x45   : > { %914 = vmatpush.bf16.msrb.mxu1 %v3060_v30  ;;  %v542_v37 = vadd.s32 8, %v4328_v34  ;;  %vm543_vm4 = vcmp.ne.s32.totalorder %v4328_v34, 0  ;;  %vm948_vm6 = vcmp.lt.s32.totalorder %v4328_v34, 1  ;;  %vm967_vm7 = vcmp.lt.s32.totalorder %v4328_v34, 7  ;;  %v3703_v48 = vld [vmem:[#allocation5 + $0x28] sm:$0xff]  ;;  %v3712_v58 = vld [vmem:[#allocation5 + $0x70] sm:$0xff] }
  0x46   : > { %928 = vmatpush.bf16.msrb.mxu2 %v3064_v31  ;;  %v999_v45 = vperm.slane %v980_v40, 1  ;;  %v1000_v47 = vperm.slane %v980_v40, 5  ;;  %v607_v49 = vperm.slane %v4333_v36, 1  ;;  %v1001_v50 = vperm.slane %v981_v1, 1  ;;  %v4356_v55 = vld [vmem:[%s5062_s5] sm:$0x7] }
  0x47   : > { %893 = vmatpush.bf16.msra.mxu3 %v2884_v60  ;;  %vm550_vm5 = vcmp.ne.s32.totalorder %v542_v37, 15  ;;  %v984_v51 = vperm.slane %v980_v40, 0  ;;  %v1020_v52 = vperm.slane %v980_v40, 2  ;;  %v1021_v57 = vperm.slane %v980_v40, 6  ;;  %v3720_v10 = vld [vmem:[#allocation5 + $0xb0] sm:$0xff]  ;;  %v3711_v16 = vld [vmem:[#allocation5 + $0x68] sm:$0xff] }
  0x48   : > { %907 = vmatpush.bf16.msrb.mxu0 %v2888_v0  ;;  %v4361_v59 = vsel %vm543_vm4, 1.0, %v4161_v27  ;;  %v4365_v60 = vsel %vm550_vm5, 1.0, %v4161_v27  ;;  %v1022_v61 = vperm.slane %v981_v1, 2  ;;  %v986_v62 = vperm.slane %v981_v1, 0  ;;  %s2771_s18 = scalar_lea.sflag [#allocation4], %s493_s27  ;;  %s4096_s20 = sshra.s32 %s2784_s28, 4  ;;  %s4097_s20 = int_to_ptr.hbm [resolvable:$true] %s4096_s20 }
  0x49   : > { %915 = vmatpush.bf16.msrb.mxu1 %v3036_v41  ;;  %v1005_v0 = vperm.slane %v999_v45, 1  ;;  %v4370_v7 = vperm.slane %v1001_v50, 1  ;;  %v4372_v8 = vperm.slane %v984_v51, 0  ;;  %v610_v20 = vperm.slane %v4333_v36, 4  ;;  %s4098_s21 = scalar_lea.hbm %s4097_s20, 1  ;;  %s4102_s29 = scalar_lea.hbm %s5071_s14, 2 }
  0x4a   : > { %929 = vmatpush.bf16.msrb.mxu2 %v3040_v44  ;;  %v606_v44 = vperm.slane %v4333_v36, 0  ;;  %v4385_v18 = vperm.slane %v986_v62, 0  ;;  %v4387_v19 = vperm.slane %v1022_v61, 2  ;;  %vm2768_vm5 = vcmask 8192   ;;  %p4099_p0 = scmp.ne.s32.totalorder %s4097_s20, %s4098_s21  ;;  %p4103_p3 = scmp.lt.s32.totalorder %s4097_s20, %s5071_s14 }
  0x4b   : > { %1332 = vmatpush.bf16.msrb.mxu3 %v3705_v35  ;;  %v3719_v35 = vld [vmem:[#allocation5 + $0xa8] sm:$0xff]  ;;  %p4104_p4 = scmp.lt.s32.totalorder %s4102_s29, %s4098_s21 }
  0x4c   : > { %p4100_p1 = pnand %p4099_p0, %p4276_p5 }
  0x4d   : > { %916 = vmatpush.bf16.msrb.mxu1 %v3012_v53  ;;  %v3721_v53 = vld [vmem:[#allocation5 + $0xb8] sm:$0xff]  ;;  %p4105_p7 = por %p4104_p4, %p4103_p3 }
  0x4e   : > { %930 = vmatpush.bf16.msrb.mxu2 %v3016_v56  ;;  %v985_v56 = vperm.slane %v980_v40, 4  ;;  %p4101_p2 = pneg %p4100_p1 }
  0x4f   : > { %1333 = vmatpush.bf16.msrb.mxu3 %v3704_v39 }
  0x50   : > { %v4381_v14 = vperm.slane %v985_v56, 0  ;;  %p4106_p8 = pnand %p4105_p7, %p4101_p2 }
  0x51   : > { %917 = vmatpush.bf16.msrb.mxu1 %v2988_v2 }
  0x53   : > { %1334 = vmatpush.bf16.msrb.mxu3 %v3703_v48 }
  0x55   : > { %918 = vmatpush.bf16.msrb.mxu1 %v2964_v9  ;;  %v4374_v9 = vperm.slane %v1020_v52, 2  ;;  %v3700_v52 = vld [vmem:[#allocation5 + $0x10] sm:$0xff] }
  0x9a   : > { %v508_v4 = vpop.permute.xlu0 %507 }
  0x9b   : > { %vm512_vm1 = vcmp.eq.s32.totalorder %v508_v4, %v505_v13  ;;  %v2989_v4 = vld [vmem:[#allocation2 + $0xe8] sm:$0xf0] }
  0x9c   : > { %v514_v28 = vsel %vm512_vm1, 1.0, %v4161_v27  ;;  %v2992_v5 = vor.u32 %v3676_v3, %v2989_v4  ;;  %v4367_v3 = vperm.slane %v1000_v47, 1  ;;  %v608_v4 = vperm.slane %v4333_v36, 2 }
  0x9e   : > { %931 = vmatpush.bf16.msrb.mxu2 %v2992_v5  ;;  %v3702_v5 = vld [vmem:[#allocation5 + $0x20] sm:$0xff] }
  0x9f   : > { %1335 = vmatpush.bf16.msrb.mxu3 %v3702_v5  ;;  %v3709_v5 = vld [vmem:[#allocation5 + $0x58] sm:$0xff] }
  0xa2   : > { %v511_v24 = vpop.permute.xlu0 %510  ;;  %932 = vmatpush.bf16.msrb.mxu2 %v2968_v11 }
  0xa3   : > { %vm513_vm2 = vcmp.eq.s32.totalorder %v511_v24, %v505_v13  ;;  %v3667_v13 = vld [vmem:[#allocation2 + $0x84] sm:$0xf0]  ;;  %v2891_v24 = vld [vmem:[#allocation2 + $0x10] sm:$0xf] }
  0xa4   : > { %v515_v29 = vsel %vm513_vm2, 1.0, %v4161_v27  ;;  %v2940_v15 = vor.u32 %v3667_v13, %v2939_v12  ;;  %v1043_v27 = vperm.slane %v4356_v55, 0 }
  0xa5   : > { %v516_v32 = vpack.c.bf16 %v515_v29, %v514_v28  ;;  %v2893_v28 = vld [vmem:[#allocation2 + $0x28] sm:$0xf0]  ;;  %v2892_v29 = vor.u32 %v3655_v25, %v2891_v24  ;;  %v611_v24 = vperm.slane %v4333_v36, 5  ;;  %v1045_v25 = vperm.slane %v4356_v55, 2 }
  0xa6   : > { %919 = vmatpush.bf16.msrb.mxu1 %v2940_v15  ;;  %933 = vmatpush.bf16.msrb.mxu2 %v2944_v17  ;;  %v2896_v30 = vor.u32 %v3652_v26, %v2893_v28  ;;  %v4383_v15 = vperm.slane %v1021_v57, 2  ;;  %v3701_v26 = vld [vmem:[#allocation5 + $0x18] sm:$0xff] }
  0xa7   : > { %2870 = vmatmul.msk.bf16.vlgmr.msra.gmra.mxu0 %vm518_vm3, %v516_v32  ;;  %1336 = vmatpush.bf16.msrb.mxu3 %v3701_v26 }
  0xa8   : > { %1346 = vmatpush.bf16.msra.mxu0 %v3713_v42 }
  0xaa   : > { %920 = vmatpush.bf16.msrb.mxu1 %v2916_v22  ;;  %934 = vmatpush.bf16.msrb.mxu2 %v2920_v23  ;;  %v1044_v23 = vperm.slane %v4356_v55, 1 }
  0xab   : > { %1337 = vmatpush.bf16.msrb.mxu3 %v3700_v52 }
  0xac   : > { %1347 = vmatpush.bf16.msra.mxu0 %v3712_v58  ;;  %v3718_v58 = vld [vmem:[#allocation5 + $0xa0] sm:$0xff] }
  0xae   : > { %921 = vmatpush.bf16.msrb.mxu1 %v2892_v29  ;;  %935 = vmatpush.bf16.msrb.mxu2 %v2896_v30 }
  0xb0   : > { %1348 = vmatpush.bf16.msra.mxu0 %v3711_v16 }
 0x124   : > { %v4321_v31 = vpop.f32.mrf.mxu0 }
 0x12c   : > { %v4323_v32 = vpop.f32.mrf.mxu0 }
 0x12d   : > { %v555_v33 = vpack.c.bf16 %v4323_v32, %v4321_v31 }
 0x12f   : > { %866 = vmatmul.bf16.vlgmr.msra.gmra.mxu1 %v555_v33  ;;  %880 = vmatmul.bf16.vlgmr.msra.gmra.mxu2 %v555_v33 }
 0x130   : > { %894 = vmatmul.bf16.vlgmr.msra.gmra.mxu3 %v555_v33  ;;  %908 = vmatmul.bf16.vlgmr.msrb.gmra.mxu0 %v555_v33 }
 0x131   : > { %1360 = vmatpush.bf16.msra.mxu1 %v3721_v53 }
 0x135   : > { %1361 = vmatpush.bf16.msra.mxu1 %v3720_v10 }
 0x139   : > { %1362 = vmatpush.bf16.msra.mxu1 %v3719_v35 }
 0x13d   : > { %1363 = vmatpush.bf16.msra.mxu1 %v3718_v58  ;;  %v3716_v58 = vld [vmem:[#allocation5 + $0x90] sm:$0xff] }
 0x13f   : > { %922 = vmatmul.bf16.vlgmr.msrb.gmra.mxu1 %v555_v33  ;;  %936 = vmatmul.bf16.vlgmr.msrb.gmra.mxu2 %v555_v33 }
 0x1ac   : > { %v867_v41 = vpop.f32.mrf.mxu1 }
 0x1ad   : > { %v909_v43 = vpop.f32.mrf.mxu0  ;;  %v868_v63 = vadd.f32 %v867_v41, %v606_v44  ;;  %v3710_v41 = vld [vmem:[#allocation5 + $0x60] sm:$0xff] }
 0x1ae   : > { %v4349_v46 = vadd.f32 %v909_v43, %v609_v38  ;;  %1349 = vmatpush.bf16.msra.mxu0 %v3710_v41  ;;  %v3708_v41 = vld [vmem:[#allocation5 + $0x50] sm:$0xff] }
 0x1af   : > { %v942_v21 = vrot.slane %v868_v63, 7  ;;  %v961_v28 = vrot.slane %v868_v63, 1  ;;  %v4395_v37 = vmul.f32 %v1005_v0, %v868_v63 }
 0x1b0   : > { %v1091_v54 = vsub.f32 0.0, %v4349_v46 }
 0x1b2   : > { %v881_v2 = vpop.f32.mrf.mxu2  ;;  %v1097_v11 = vmul.f32 1.442695, %v1091_v54  ;;  %1350 = vmatpush.bf16.msra.mxu0 %v3709_v5 }
 0x1b3   : > { %v895_v6 = vpop.f32.mrf.mxu3  ;;  %v4379_v12 = vadd.f32 %v881_v2, %v607_v49 }
 0x1b4   : > { %v869_v13 = vpop.f32.mrf.mxu1  ;;  %v4393_v29 = vadd.f32 %v895_v6, %v608_v4  ;;  %3916 = vpow2.f32 %v1097_v11 }
 0x1b5   : > { %v870_v17 = vadd.f32 %v869_v13, %v606_v44  ;;  %v911_v22 = vpop.f32.mrf.mxu0  ;;  %v943_v39 = vrot.slane %v4379_v12, 7  ;;  %v962_v40 = vrot.slane %v4379_v12, 1  ;;  %v4401_v1 = vmul.f32 %v4367_v3, %v4379_v12 }
 0x1b6   : > { %v4409_v44 = vadd.f32 %v911_v22, %v609_v38  ;;  %v944_v53 = vrot.slane %v4393_v29, 7  ;;  %v963_v54 = vrot.slane %v4393_v29, 1  ;;  %v4423_v61 = vmul.f32 %v4370_v7, %v4393_v29  ;;  %1351 = vmatpush.bf16.msra.mxu0 %v3708_v41 }
 0x1b7   : > { %v945_v30 = vrot.slane %v870_v17, 7  ;;  %v964_v33 = vrot.slane %v870_v17, 1  ;;  %v1011_v50 = vmul.f32 %v1005_v0, %v870_v17 }
 0x1b8   : > { %v1094_v10 = vsub.f32 0.0, %v4409_v44 }
 0x1b9   : > { %v949_v42 = vsel %vm948_vm6, %v942_v21, %v945_v30  ;;  %v971_v43 = vsel %vm967_vm7, %v964_v33, %v961_v28  ;;  %v952_v45 = vsel %vm948_vm6, %v945_v30, %v942_v21  ;;  %v968_v38 = vsel %vm967_vm7, %v961_v28, %v964_v33  ;;  %v3717_v30 = vld [vmem:[#allocation5 + $0x98] sm:$0xff] }
 0x1ba   : > { %v977_v47 = vmul.f32 %v4365_v60, %v971_v43  ;;  %v996_v48 = vmul.f32 %v4372_v8, %v949_v42  ;;  %v883_v51 = vpop.f32.mrf.mxu2  ;;  %v955_v6 = vmul.f32 %v4361_v59, %v952_v45  ;;  %v4431_v13 = vmul.f32 %v4374_v9, %v968_v38  ;;  %1364 = vmatpush.bf16.msra.mxu1 %v3717_v30  ;;  %v3698_v38 = vld [vmem:[#allocation5] sm:$0xff] }
 0x1bb   : > { %v884_v56 = vadd.f32 %v883_v51, %v607_v49  ;;  %v897_v57 = vpop.f32.mrf.mxu3  ;;  %v4428_v49 = vpop.eup %3916  ;;  %v1103_v42 = vmul.f32 1.442695, %v1094_v10 }
 0x1bc   : > { %v1017_v62 = vadd.f32 %v1011_v50, %v996_v48  ;;  %v1032_v63 = vmul.f32 %v4374_v9, %v977_v47  ;;  %v898_v0 = vadd.f32 %v897_v57, %v608_v4  ;;  %v923_v2 = vpop.f32.mrf.mxu1  ;;  %v3699_v4 = vld [vmem:[#allocation5 + $0x8] sm:$0xff] }
 0x1bd   : > { %v946_v11 = vrot.slane %v884_v56, 7  ;;  %v965_v12 = vrot.slane %v884_v56, 1  ;;  %v1012_v17 = vmul.f32 %v4367_v3, %v884_v56  ;;  %1338 = vmatpush.bf16.msrb.mxu3 %v3699_v4 }
 0x1be   : > { %v1038_v16 = vadd.f32 %v1032_v63, %v1017_v62  ;;  %v947_v21 = vrot.slane %v898_v0, 7  ;;  %v966_v29 = vrot.slane %v898_v0, 1  ;;  %1365 = vmatpush.bf16.msra.mxu1 %v3716_v58 }
 0x1bf   : > { %v950_v22 = vsel %vm948_vm6, %v943_v39, %v946_v11  ;;  %v953_v26 = vsel %vm948_vm6, %v946_v11, %v943_v39  ;;  %v972_v28 = vsel %vm967_vm7, %v965_v12, %v962_v40  ;;  %v969_v39 = vsel %vm967_vm7, %v962_v40, %v965_v12  ;;  %v3707_v11 = vld [vmem:[#allocation5 + $0x48] sm:$0xff] }
 0x1c0   : > { %v4442_v9 = vadd.f32 %v1043_v27, %v1038_v16  ;;  %v956_v3 = vmul.f32 %v4361_v59, %v953_v26  ;;  %v978_v33 = vmul.f32 %v4365_v60, %v972_v28  ;;  %v997_v35 = vmul.f32 %v4381_v14, %v950_v22  ;;  %1352 = vmatpush.bf16.msra.mxu0 %v3707_v11 }
 0x1c1   : > { %v951_v43 = vsel %vm948_vm6, %v944_v53, %v947_v21  ;;  %v954_v45 = vsel %vm948_vm6, %v947_v21, %v944_v53  ;;  %v973_v40 = vsel %vm967_vm7, %v966_v29, %v963_v54  ;;  %v1013_v53 = vmul.f32 %v4370_v7, %v898_v0  ;;  %1339 = vmatpush.bf16.msrb.mxu3 %v3698_v38 }
 0x1c2   : > { %v1058_v47 = vsub.f32 0.0, %v4442_v9  ;;  %v994_v48 = vmul.f32 %v4381_v14, %v956_v3  ;;  %v1018_v50 = vadd.f32 %v1012_v17, %v997_v35  ;;  %v1033_v51 = vmul.f32 %v4383_v15, %v978_v33  ;;  %v937_v52 = vpop.f32.mrf.mxu2 }
 0x1c3   : > { %v957_v56 = vmul.f32 %v4361_v59, %v954_v45  ;;  %v998_v57 = vmul.f32 %v4385_v18, %v951_v43  ;;  %v970_v14 = vsel %vm967_vm7, %v963_v54, %v966_v29  ;;  %v979_v5 = vmul.f32 %v4365_v60, %v973_v40 }
 0x1c4   : > { %v1067_v62 = vmul.f32 1.442695, %v1058_v47  ;;  %v1039_v63 = vadd.f32 %v1033_v51, %v1018_v50  ;;  %v925_v10 = vpop.f32.mrf.mxu1  ;;  %v993_v12 = vmul.f32 %v4372_v8, %v955_v6  ;;  %v1030_v16 = vmul.f32 %v4383_v15, %v969_v39  ;;  %v3706_v51 = vld [vmem:[#allocation5 + $0x40] sm:$0xff] }
 0x1c5   : > { %v995_v17 = vmul.f32 %v4385_v18, %v957_v56  ;;  %v1019_v21 = vadd.f32 %v1013_v53, %v998_v57  ;;  %v1034_v7 = vmul.f32 %v4387_v19, %v979_v5  ;;  %v4470_v0 = vadd.f32 %v923_v2, %v610_v20  ;;  %1353 = vmatpush.bf16.msra.mxu0 %v3706_v51  ;;  %v3714_v57 = vld [vmem:[#allocation5 + $0x80] sm:$0xff] }
 0x1c6   : > { %3918 = vpow2.f32 %v1067_v62  ;;  %v1015_v54 = vadd.f32 %v4401_v1, %v994_v48  ;;  %v1031_v4 = vmul.f32 %v4387_v19, %v970_v14  ;;  %v4476_v8 = vadd.f32 %v937_v52, %v611_v24 }
 0x1c7   : > { %v1016_v15 = vadd.f32 %v4423_v61, %v995_v17  ;;  %v4481_v18 = vadd.f32 %v925_v10, %v610_v20  ;;  %v1040_v6 = vadd.f32 %v1034_v7, %v1019_v21  ;;  %v1092_v2 = vsub.f32 0.0, %v4470_v0 }
 0x1c8   : > { %v1036_v22 = vadd.f32 %v1030_v16, %v1015_v54  ;;  %v4486_v1 = vadd.f32 %v1044_v23, %v1039_v63  ;;  %3920 = vpow2.f32 %v1103_v42  ;;  %v1093_v26 = vsub.f32 0.0, %v4476_v8 }
 0x1c9   : > { %v1037_v19 = vadd.f32 %v1031_v4, %v1016_v15  ;;  %v1095_v28 = vsub.f32 0.0, %v4481_v18  ;;  %v1099_v20 = vmul.f32 1.442695, %v1092_v2  ;;  %v4497_v3 = vadd.f32 %v1045_v25, %v1040_v6 }
 0x1ca   : > { %v4492_v61 = vadd.f32 %v1044_v23, %v1036_v22  ;;  %v1059_v29 = vsub.f32 0.0, %v4486_v1  ;;  %v939_v30 = vpop.f32.mrf.mxu2  ;;  %v1101_v35 = vmul.f32 1.442695, %v1093_v26  ;;  %v1014_v23 = vadd.f32 %v4395_v37, %v993_v12 }
 0x1cb   : > { %v4501_v33 = vadd.f32 %v1045_v25, %v1037_v19  ;;  %v4505_v41 = vadd.f32 %v939_v30, %v611_v24  ;;  %3922 = vpow2.f32 %v1099_v20  ;;  %v1060_v45 = vsub.f32 0.0, %v4497_v3  ;;  %v3715_v24 = vld [vmem:[#allocation5 + $0x88] sm:$0xff] }
 0x1cc   : > { %v3919_v42 = vpop.eup %3918  ;;  %v1056_v39 = vsub.f32 0.0, %v4492_v61  ;;  %v1069_v43 = vmul.f32 1.442695, %v1059_v29  ;;  %3924 = vpow2.f32 %v1101_v35  ;;  %v1105_v36 = vmul.f32 1.442695, %v1095_v28  ;;  %1366 = vmatpush.bf16.msra.mxu1 %v3715_v24 }
 0x1cd   : > { %v1076_v47 = vadd.f32 1.0, %v3919_v42  ;;  %v1057_v48 = vsub.f32 0.0, %v4501_v33  ;;  %v1096_v25 = vsub.f32 0.0, %v4505_v41  ;;  %v1071_v38 = vmul.f32 1.442695, %v1060_v45 }
 0x1ce   : > { %v1063_v50 = vmul.f32 1.442695, %v1056_v39  ;;  %3926 = vpow2.f32 %v1069_v43  ;;  %v3921_v52 = vpop.eup %3920  ;;  %v1035_v56 = vadd.f32 %v4431_v13, %v1014_v23  ;;  %v1109_v15 = vadd.f32 1.0, %v4428_v49 }
 0x1cf   : > { %3928 = vrcp.f32 %v1076_v47  ;;  %v1065_v37 = vmul.f32 1.442695, %v1057_v48  ;;  %v1107_v40 = vmul.f32 1.442695, %v1096_v25  ;;  %v1112_v2 = vadd.f32 1.0, %v3921_v52 }
 0x1d0   : > { %3930 = vpow2.f32 %v1063_v50  ;;  %v4515_v53 = vadd.f32 %v1043_v27, %v1035_v56  ;;  %1367 = vmatpush.bf16.msra.mxu1 %v3714_v57 }
 0x1d1   : > { %3932 = vpow2.f32 %v1065_v37  ;;  %v3923_v58 = vpop.eup %3922 }
 0x1d2   : > { %3934 = vpow2.f32 %v1105_v36  ;;  %v3925_v62 = vpop.eup %3924  ;;  %v1110_v63 = vadd.f32 1.0, %v3923_v58  ;;  %v1055_v14 = vsub.f32 0.0, %v4515_v53 }
 0x1d3   : > { %3936 = vpow2.f32 %v1071_v38  ;;  %v1111_v10 = vadd.f32 1.0, %v3925_v62 }
 0x1d4   : > { %v3927_v5 = vpop.eup %3926  ;;  %3938 = vpow2.f32 %v1107_v40  ;;  %v1061_v12 = vmul.f32 1.442695, %v1055_v14 }
 0x1d5   : > { %v3929_v13 = vpop.eup %3928  ;;  %3940 = vrcp.f32 %v1110_v63  ;;  %v1077_v11 = vadd.f32 1.0, %v3927_v5 }
 0x1d6   : > { %v3931_v16 = vpop.eup %3930  ;;  %3942 = vrcp.f32 %v1111_v10 }
 0x1d7   : > { %v3933_v55 = vpop.eup %3932  ;;  %v1074_v27 = vadd.f32 1.0, %v3931_v16  ;;  %3944 = vrcp.f32 %v1077_v11 }
 0x1d8   : > { %v3935_v17 = vpop.eup %3934  ;;  %v1075_v21 = vadd.f32 1.0, %v3933_v55  ;;  %3946 = vpow2.f32 %v1061_v12 }
 0x1d9   : > { %v3937_v7 = vpop.eup %3936  ;;  %3948 = vrcp.f32 %v1074_v27  ;;  %v1113_v54 = vadd.f32 1.0, %v3935_v17  ;;  %v4162_v27 = vmov 128.0  }
 0x1da   : > { %v3939_v4 = vpop.eup %3938  ;;  %3950 = vrcp.f32 %v1075_v21  ;;  %v1078_v6 = vadd.f32 1.0, %v3937_v7  ;;  %v3332_v7 = vld [vmem:[#allocation2 + $0x2d0] sm:$0xf] }
 0x1db   : > { %v3941_v22 = vpop.eup %3940  ;;  %3952 = vrcp.f32 %v1113_v54  ;;  %v1114_v19 = vadd.f32 1.0, %v3939_v4  ;;  %v3767_v54 = vld [vmem:[#allocation2 + $0x2e4] sm:$0xf0]  ;;  %v3764_v4 = vld [vmem:[#allocation2 + $0x2d4] sm:$0xf] }
 0x1dc   : > { %v3943_v26 = vpop.eup %3942  ;;  %3954 = vrcp.f32 %v1078_v6  ;;  %v1122_v49 = vmul.f32 %v3941_v22, %v4470_v0  ;;  %v3334_v6 = vld [vmem:[#allocation2 + $0x2e8] sm:$0xf0]  ;;  %v3761_v22 = vld [vmem:[#allocation2 + $0x2b4] sm:$0xf0] }
 0x1dd   : > { %v3945_v28 = vpop.eup %3944  ;;  %3956 = vrcp.f32 %v1114_v19  ;;  %v1123_v36 = vmul.f32 %v3943_v26, %v4476_v8  ;;  %v3758_v19 = vld [vmem:[#allocation2 + $0x2a4] sm:$0xf]  ;;  %v3310_v26 = vld [vmem:[#allocation2 + $0x2b8] sm:$0xf0] }
 0x1de   : > { %v3947_v20 = vpop.eup %3946  ;;  %3958 = vrcp.f32 %v1109_v15  ;;  %v1089_v42 = vmul.f32 %v3945_v28, %v4486_v1  ;;  %v1088_v1 = vmul.f32 %v3929_v13, %v4442_v9  ;;  %v3910_v9 = vld [vmem:[%s5064_s7] ss:$0 sm:$0xff]  ;;  %v3333_v15 = vor.u32 %v3767_v54, %v3332_v7 }
 0x1df   : > { %v3949_v29 = vpop.eup %3948  ;;  %3960 = vrcp.f32 %v1112_v2  ;;  %v1073_v30 = vadd.f32 1.0, %v3947_v20  ;;  %v3337_v2 = vor.u32 %v3764_v4, %v3334_v6  ;;  %v3753_v4 = vld [vmem:[#allocation2 + $0x27c] sm:$0xf] }
 0x1e0   : > { %v3951_v35 = vpop.eup %3950  ;;  %v1086_v23 = vmul.f32 %v3949_v29, %v4492_v61  ;;  %1740 = vmatpush.bf16.msra.mxu2 %v3333_v15  ;;  %v3294_v15 = vld [vmem:[#allocation2 + $0x290] sm:$0xf0] }
 0x1e1   : > { %v3953_v39 = vpop.eup %3952  ;;  %3962 = vrcp.f32 %v1073_v30  ;;  %v1087_v47 = vmul.f32 %v3951_v35, %v4501_v33  ;;  %1754 = vmatpush.bf16.msra.mxu3 %v3337_v2  ;;  %v3297_v6 = vor.u32 %v3753_v4, %v3294_v15  ;;  %v3728_v2 = vld [vmem:[#allocation2 + $0x1b4] sm:$0xf]  ;;  %v3172_v15 = vld [vmem:[#allocation2 + $0x188] sm:$0xf] }
 0x1e2   : > { %v3955_v43 = vpop.eup %3954  ;;  %v1128_v45 = vmul.f32 %v1122_v49, %v1086_v23  ;;  %v1125_v48 = vmul.f32 %v3953_v39, %v4481_v18  ;;  %3964 = vrcp.f32 %v4162_v27  ;;  %v3214_v27 = vld [vmem:[#allocation2 + $0x1f8] sm:$0xf0] }
 0x1e3   : > { %v3957_v25 = vpop.eup %3956  ;;  %v1090_v51 = vmul.f32 %v3955_v43, %v4497_v3  ;;  %v1129_v52 = vmul.f32 %v1123_v36, %v1087_v47  ;;  %v3752_v36 = vld [vmem:[#allocation2 + $0x274] sm:$0xf] }
 0x1e4   : > { %v3959_v50 = vpop.eup %3958  ;;  %v1131_v24 = vmul.f32 %v1125_v48, %v1089_v42  ;;  %v1126_v61 = vmul.f32 %v3957_v25, %v4505_v41  ;;  %v3284_v25 = vld [vmem:[#allocation2 + $0x270] sm:$0xf] }
 0x1e5   : > { %v3961_v0 = vpop.eup %3960  ;;  %v1121_v33 = vmul.f32 %v3959_v50, %v4349_v46  ;;  %v3755_v50 = vld [vmem:[#allocation2 + $0x284] sm:$0xf0] }
 0x1e6   : > { %v1134_v37 = vpack.c.bf16 %v1131_v24, %v1128_v45  ;;  %v1132_v38 = vmul.f32 %v1126_v61, %v1090_v51  ;;  %v1124_v18 = vmul.f32 %v3961_v0, %v4409_v44  ;;  %v3285_v24 = vor.u32 %v3755_v50, %v3284_v25  ;;  %v3286_v51 = vld [vmem:[#allocation2 + $0x288] sm:$0xf0]  ;;  %v3260_v0 = vld [vmem:[#allocation2 + $0x240] sm:$0xf]  ;;  %v3166_v25 = vld [vmem:[#allocation2 + $0x198] sm:$0xf0] }
 0x1e7   : > { %v3963_v56 = vpop.eup %3962  ;;  %v3289_v61 = vor.u32 %v3752_v36, %v3286_v51  ;;  %v3244_v50 = vld [vmem:[#allocation2 + $0x218] sm:$0xf]  ;;  %v3744_v36 = vld [vmem:[#allocation2 + $0x22c] sm:$0xf0] }
 0x1e8   : > { %v1135_v40 = vpack.c.bf16 %v1132_v38, %v1129_v52  ;;  %v1085_v57 = vmul.f32 %v3963_v56, %v4515_v53  ;;  %1354 = vmatmul.bf16.vlgmr.msra.gmra.mxu0 %v1134_v37  ;;  %v1130_v8 = vmul.f32 %v1124_v18, %v1088_v1  ;;  %v3965_v17 = vpop.eup %3964  ;;  %v3749_v1 = vld [vmem:[#allocation2 + $0x254] sm:$0xf0]  ;;  %v3746_v52 = vld [vmem:[#allocation2 + $0x244] sm:$0xf]  ;;  %v3262_v38 = vld [vmem:[#allocation2 + $0x258] sm:$0xf0]  ;;  %v3245_v51 = vor.u32 %v3744_v36, %v3244_v50 }
 0x1e9   : > { %v1381_v21 = vmul.f32 128.0, %v3965_v17  ;;  %vm1385_vm8 = vweird.f32 %v3965_v17  ;;  %v3261_v37 = vor.u32 %v3749_v1, %v3260_v0  ;;  %v3340_v56 = vld [vmem:[#allocation2 + $0x2d8] sm:$0xf]  ;;  %v3265_v18 = vor.u32 %v3746_v52, %v3262_v38  ;;  %v3246_v0 = vld [vmem:[#allocation2 + $0x230] sm:$0xf0] }
 0x1ea   : > { %v1127_v58 = vmul.f32 %v1121_v33, %v1085_v57  ;;  %1368 = vmatmul.bf16.vlgmr.msra.gmra.mxu1 %v1135_v40  ;;  %v3768_v33 = vld [vmem:[#allocation2 + $0x2ec] sm:$0xf0]  ;;  %v3765_v57 = vld [vmem:[#allocation2 + $0x2dc] sm:$0xf]  ;;  %v3348_v1 = vld [vmem:[#allocation2 + $0x2e0] sm:$0xf] }
 0x1eb   : > { %v1382_v28 = vsub.f32 1.0, %v1381_v21  ;;  %v3341_v40 = vor.u32 %v3768_v33, %v3340_v56  ;;  %v3756_v21 = vld [vmem:[#allocation2 + $0x28c] sm:$0xf0]  ;;  %v3766_v38 = vld [vmem:[#allocation2 + $0x2e4] sm:$0xf] }
 0x1ec   : > { %v1133_v3 = vpack.c.bf16 %v1130_v8, %v1127_v58  ;;  %v3342_v8 = vld [vmem:[#allocation2 + $0x2f0] sm:$0xf0]  ;;  %v3350_v56 = vld [vmem:[#allocation2 + $0x2f8] sm:$0xf0]  ;;  %v3228_v36 = vld [vmem:[#allocation2 + $0x1f0] sm:$0xf] }
 0x1ed   : > { %v1383_v29 = vmul.f32 %v3965_v17, %v1382_v28  ;;  %v3345_v58 = vor.u32 %v3765_v57, %v3342_v8  ;;  %1768 = vmatpush.bf16.msrb.mxu0 %v3341_v40  ;;  %v3268_v28 = vld [vmem:[#allocation2 + $0x248] sm:$0xf]  ;;  %v3738_v57 = vld [vmem:[#allocation2 + $0x1fc] sm:$0xf0]  ;;  %v3735_v8 = vld [vmem:[#allocation2 + $0x1ec] sm:$0xf] }
 0x1ee   : > { %1340 = vmatmul.bf16.vlgmr.msrb.gmra.mxu3 %v1133_v3  ;;  %v3236_v3 = vld [vmem:[#allocation2 + $0x210] sm:$0xf]  ;;  %v3220_v40 = vld [vmem:[#allocation2 + $0x1e8] sm:$0xf] }
 0x1ef   : > { %v1384_v30 = vadd.f32 %v3965_v17, %v1383_v29  ;;  %1782 = vmatpush.bf16.msrb.mxu1 %v3345_v58  ;;  %v3221_v58 = vor.u32 %v3738_v57, %v3220_v40  ;;  %v3206_v40 = vld [vmem:[#allocation2 + $0x1d8] sm:$0xf0] }
 0x1f1   : > { %v4536_v35 = vsel %vm1385_vm8, %v3965_v17, %v1384_v30  ;;  %v3292_v17 = vld [vmem:[#allocation2 + $0x278] sm:$0xf]  ;;  %v3747_v30 = vld [vmem:[#allocation2 + $0x24c] sm:$0xf] }
 0x1f2   : > { %v3293_v54 = vor.u32 %v3756_v21, %v3292_v17  ;;  %v3754_v17 = vld [vmem:[#allocation2 + $0x284] sm:$0xf]  ;;  %v3302_v21 = vld [vmem:[#allocation2 + $0x298] sm:$0xf0] }
 0x265   : > { %v1355_v41 = vpop.f32.mrf.mxu0 }
 0x267   : > { %v1369_v63 = vpop.f32.mrf.mxu1 }
 0x26d   : > { %v1357_v13 = vpop.f32.mrf.mxu0 }
 0x26f   : > { %v1371_v11 = vpop.f32.mrf.mxu1 }
 0x271   : > { %v1341_v62 = vpop.f32.mrf.mxu3 }
 0x272   : > { %v1342_v14 = vadd.f32 %v3910_v9, %v1341_v62 }
 0x274   : > { %v1356_v46 = vadd.f32 %v1355_v41, %v1342_v14  ;;  %v3740_v41 = vld [vmem:[#allocation2 + $0x214] sm:$0xf]  ;;  %v3316_v14 = vld [vmem:[#allocation2 + $0x2a8] sm:$0xf] }
 0x276   : > { %v1370_v5 = vadd.f32 %v1369_v63, %v1356_v46  ;;  %v3238_v63 = vld [vmem:[#allocation2 + $0x228] sm:$0xf0]  ;;  %v3762_v46 = vld [vmem:[#allocation2 + $0x2bc] sm:$0xf0] }
 0x278   : > { %v1374_v44 = vadd.f32 %v1370_v5, %v4321_v31  ;;  %v3308_v31 = vld [vmem:[#allocation2 + $0x2a0] sm:$0xf]  ;;  %v3241_v5 = vor.u32 %v3740_v41, %v3238_v63  ;;  %v3763_v41 = vld [vmem:[#allocation2 + $0x2c4] sm:$0xf0] }
 0x279   : > { %v1343_v10 = vpop.f32.mrf.mxu3  ;;  %v3309_v20 = vor.u32 %v3761_v22, %v3308_v31  ;;  %v3188_v31 = vld [vmem:[#allocation2 + $0x1b0] sm:$0xf]  ;;  %v3731_v22 = vld [vmem:[#allocation2 + $0x1c4] sm:$0xf0] }
 0x27a   : > { %v1344_v53 = vadd.f32 %v3910_v9, %v1343_v10  ;;  %1376 = vadd.xlane.f32.xlu1 %v1374_v44  ;;  %v3743_v9 = vld [vmem:[#allocation2 + $0x224] sm:$0xf0]  ;;  %v3759_v10 = vld [vmem:[#allocation2 + $0x2ac] sm:$0xf] }
 0x27b   : > { %1741 = vmatpush.bf16.msra.mxu2 %v3309_v20  ;;  %v3237_v62 = vor.u32 %v3743_v9, %v3236_v3  ;;  %v3750_v20 = vld [vmem:[#allocation2 + $0x25c] sm:$0xf0]  ;;  %v3222_v3 = vld [vmem:[#allocation2 + $0x200] sm:$0xf0]  ;;  %v3324_v9 = vld [vmem:[#allocation2 + $0x2b0] sm:$0xf] }
 0x27c   : > { %v1358_v12 = vadd.f32 %v1357_v13, %v1344_v53  ;;  %v3318_v53 = vld [vmem:[#allocation2 + $0x2c0] sm:$0xf0]  ;;  %v3269_v29 = vor.u32 %v3750_v20, %v3268_v28  ;;  %v3325_v63 = vor.u32 %v3763_v41, %v3324_v9  ;;  %v3180_v9 = vld [vmem:[#allocation2 + $0x190] sm:$0xf]  ;;  %v3727_v41 = vld [vmem:[#allocation2 + $0x1a4] sm:$0xf0] }
 0x27d   : > { %v3321_v13 = vor.u32 %v3759_v10, %v3318_v53  ;;  %v3732_v10 = vld [vmem:[#allocation2 + $0x1cc] sm:$0xf0]  ;;  %v3729_v53 = vld [vmem:[#allocation2 + $0x1bc] sm:$0xf] }
 0x27e   : > { %v1372_v16 = vadd.f32 %v1371_v11, %v1358_v12  ;;  %v3212_v11 = vld [vmem:[#allocation2 + $0x1e0] sm:$0xf]  ;;  %v3737_v12 = vld [vmem:[#allocation2 + $0x1f4] sm:$0xf0] }
 0x27f   : > { %1742 = vmatpush.bf16.msra.mxu2 %v3285_v24  ;;  %1783 = vmatpush.bf16.msrb.mxu1 %v3321_v13 }
 0x280   : > { %v1375_v55 = vadd.f32 %v1372_v16, %v4323_v32  ;;  %v3313_v32 = vor.u32 %v3758_v19, %v3310_v26  ;;  %v3734_v16 = vld [vmem:[#allocation2 + $0x1e4] sm:$0xf]  ;;  %v3189_v19 = vor.u32 %v3731_v22, %v3188_v31  ;;  %v3190_v26 = vld [vmem:[#allocation2 + $0x1c8] sm:$0xf0] }
 0x281   : > { %v3217_v7 = vor.u32 %v3734_v16, %v3214_v27  ;;  %v3757_v16 = vld [vmem:[#allocation2 + $0x294] sm:$0xf0]  ;;  %v3723_v31 = vld [vmem:[#allocation2 + $0x18c] sm:$0xf] }
 0x282   : > { %1378 = vadd.xlane.f32.xlu1 %v1375_v55  ;;  %1755 = vmatpush.bf16.msra.mxu3 %v3313_v32  ;;  %v3193_v32 = vor.u32 %v3728_v2, %v3190_v26  ;;  %v3174_v2 = vld [vmem:[#allocation2 + $0x1a0] sm:$0xf0]  ;;  %v3751_v26 = vld [vmem:[#allocation2 + $0x264] sm:$0xf0] }
 0x283   : > { %1743 = vmatpush.bf16.msra.mxu2 %v3261_v37  ;;  %1784 = vmatpush.bf16.msrb.mxu1 %v3297_v6  ;;  %v3769_v37 = vld [vmem:[#allocation2 + $0x2f4] sm:$0xf0]  ;;  %v3726_v6 = vld [vmem:[#allocation2 + $0x19c] sm:$0xf0]  ;;  %v3177_v20 = vor.u32 %v3723_v31, %v3174_v2 }
 0x284   : > { %v3349_v33 = vor.u32 %v3769_v37, %v3348_v1  ;;  %v3173_v22 = vor.u32 %v3726_v6, %v3172_v15  ;;  %v3204_v37 = vld [vmem:[#allocation2 + $0x1c0] sm:$0xf] }
 0x286   : > { %1756 = vmatpush.bf16.msra.mxu3 %v3289_v61  ;;  %v3741_v61 = vld [vmem:[#allocation2 + $0x21c] sm:$0xf] }
 0x287   : > { %1744 = vmatpush.bf16.msra.mxu2 %v3237_v62  ;;  %v3249_v52 = vor.u32 %v3741_v61, %v3246_v0  ;;  %v3225_v62 = vor.u32 %v3735_v8, %v3222_v3  ;;  %v3230_v0 = vld [vmem:[#allocation2 + $0x208] sm:$0xf0] }
 0x28a   : > { %1757 = vmatpush.bf16.msra.mxu3 %v3265_v18  ;;  %v3353_v18 = vor.u32 %v3766_v38, %v3350_v56  ;;  %v3733_v38 = vld [vmem:[#allocation2 + $0x1d4] sm:$0xf0] }
 0x28e   : > { %1758 = vmatpush.bf16.msra.mxu3 %v3241_v5 }
 0x292   : > { %1759 = vmatpush.bf16.msra.mxu3 %v3217_v7 }
 0x296   : > { %1760 = vmatpush.bf16.msra.mxu3 %v3193_v32 }
 0x2ed   : > { %v1377_v23 = vpop.xlane.xlu1 %1376 }
 0x2ee   : > { %v1387_v49 = vmul.f32 %v4536_v35, %v1377_v23  ;;  %v3270_v23 = vld [vmem:[#allocation2 + $0x260] sm:$0xf0] }
 0x2f0   : > { %v4539_v42 = vsub.f32 %v1374_v44, %v1387_v49  ;;  %v3317_v44 = vor.u32 %v3762_v46, %v3316_v14  ;;  %v3273_v49 = vor.u32 %v3747_v30, %v3270_v23  ;;  %v3760_v14 = vld [vmem:[#allocation2 + $0x2b4] sm:$0xf]  ;;  %v3326_v46 = vld [vmem:[#allocation2 + $0x2c8] sm:$0xf0] }
 0x2f1   : > { %v3329_v5 = vor.u32 %v3760_v14, %v3326_v46  ;;  %v3278_v30 = vld [vmem:[#allocation2 + $0x268] sm:$0xf0] }
 0x2f2   : > { %v1391_v39 = vmul.f32 %v4539_v42, %v4539_v42  ;;  %1769 = vmatpush.bf16.msrb.mxu0 %v3317_v44  ;;  %1785 = vmatpush.bf16.msrb.mxu1 %v3273_v49  ;;  %v3196_v44 = vld [vmem:[#allocation2 + $0x1b8] sm:$0xf]  ;;  %v3252_v49 = vld [vmem:[#allocation2 + $0x220] sm:$0xf] }
 0x2f3   : > { %v3197_v13 = vor.u32 %v3732_v10, %v3196_v44 }
 0x2f4   : > { %1393 = vadd.xlane.f32.xlu2 %v1391_v39  ;;  %v3164_v39 = vld [vmem:[#allocation2 + $0x180] sm:$0xf] }
 0x2f5   : > { %v1379_v43 = vpop.xlane.xlu1 %1378 }
 0x2f6   : > { %v1388_v45 = vmul.f32 %v4536_v35, %v1379_v43  ;;  %1770 = vmatpush.bf16.msrb.mxu0 %v3293_v54  ;;  %v3725_v43 = vld [vmem:[#allocation2 + $0x194] sm:$0xf0]  ;;  %1786 = vmatpush.bf16.msrb.mxu1 %v3249_v52  ;;  %v3305_v54 = vor.u32 %v3754_v17, %v3302_v21 }
 0x2f8   : > { %v4544_v47 = vsub.f32 %v1375_v55, %v1388_v45  ;;  %v3213_v55 = vor.u32 %v3737_v12, %v3212_v11  ;;  %v3722_v45 = vld [vmem:[#allocation2 + $0x184] sm:$0xf]  ;;  %v3198_v11 = vld [vmem:[#allocation2 + $0x1d0] sm:$0xf0]  ;;  %v3300_v12 = vld [vmem:[#allocation2 + $0x280] sm:$0xf] }
 0x2f9   : > { %v3169_v24 = vor.u32 %v3722_v45, %v3166_v25  ;;  %v3301_v27 = vor.u32 %v3757_v16, %v3300_v12 }
 0x2fa   : > { %v1392_v48 = vmul.f32 %v4544_v47, %v4544_v47  ;;  %1745 = vmatpush.bf16.msra.mxu2 %v3213_v55  ;;  %1771 = vmatpush.bf16.msrb.mxu0 %v3269_v29  ;;  %v3201_v55 = vor.u32 %v3729_v53, %v3198_v11  ;;  %v3748_v29 = vld [vmem:[#allocation2 + $0x254] sm:$0xf] }
 0x2fb   : > { %1761 = vmatpush.bf16.msra.mxu3 %v3169_v24  ;;  %1787 = vmatpush.bf16.msrb.mxu1 %v3225_v62  ;;  %v3281_v23 = vor.u32 %v3748_v29, %v3278_v30  ;;  %v3739_v24 = vld [vmem:[#allocation2 + $0x204] sm:$0xf0]  ;;  %v3724_v62 = vld [vmem:[#allocation2 + $0x194] sm:$0xf] }
 0x2fc   : > { %1395 = vadd.xlane.f32.xlu2 %v1392_v48  ;;  %v3165_v48 = vor.u32 %v3725_v43, %v3164_v39  ;;  %v3745_v39 = vld [vmem:[#allocation2 + $0x234] sm:$0xf0]  ;;  %v3742_v43 = vld [vmem:[#allocation2 + $0x224] sm:$0xf]  ;;  %v3229_v1 = vor.u32 %v3739_v24, %v3228_v36 }
 0x2fd   : > { %v3253_v45 = vor.u32 %v3745_v39, %v3252_v49  ;;  %v3793_v49 = vld [vmem:[#allocation5 + $0x178] sm:$0xff] }
 0x2fe   : > { %1746 = vmatpush.bf16.msra.mxu2 %v3189_v19  ;;  %1772 = vmatpush.bf16.msrb.mxu0 %v3245_v51  ;;  %v3276_v19 = vld [vmem:[#allocation2 + $0x250] sm:$0xf]  ;;  %v3736_v51 = vld [vmem:[#allocation2 + $0x1f4] sm:$0xf] }
 0x2ff   : > { %1810 = vmatpush.bf16.msrb.mxu3 %v3353_v18  ;;  %1788 = vmatpush.bf16.msrb.mxu1 %v3201_v55  ;;  %v3277_v32 = vor.u32 %v3751_v26, %v3276_v19  ;;  %v3233_v52 = vor.u32 %v3736_v51, %v3230_v0  ;;  %v3730_v18 = vld [vmem:[#allocation2 + $0x1c4] sm:$0xf]  ;;  %v3355_v19 = vld [vmem:[%s5061_s4 + $0x14] sm:$0x7]  ;;  %v3777_v26 = vld [vmem:[#allocation5 + $0xf8] sm:$0xff] }
 0x300   : > { %v3209_v3 = vor.u32 %v3730_v18, %v3206_v40  ;;  %v1882_v29 = vperm.slane %v3355_v19, 1  ;;  %v1903_v39 = vperm.slane %v3355_v19, 2 }
 0x302   : > { %1747 = vmatpush.bf16.msra.mxu2 %v3165_v48  ;;  %1773 = vmatpush.bf16.msrb.mxu0 %v3221_v58  ;;  %v3254_v48 = vld [vmem:[#allocation2 + $0x238] sm:$0xf0]  ;;  %v3205_v58 = vor.u32 %v3733_v38, %v3204_v37  ;;  %v1888_v38 = vperm.slane %v1882_v29, 1 }
 0x303   : > { %1811 = vmatpush.bf16.msrb.mxu3 %v3329_v5  ;;  %1789 = vmatpush.bf16.msrb.mxu1 %v3177_v20  ;;  %v3257_v50 = vor.u32 %v3742_v43, %v3254_v48  ;;  %v3181_v5 = vor.u32 %v3727_v41, %v3180_v9  ;;  %v1867_v48 = vperm.slane %v3355_v19, 0 }
 0x306   : > { %1796 = vmatpush.bf16.msrb.mxu2 %v3349_v33  ;;  %1774 = vmatpush.bf16.msrb.mxu0 %v3197_v13 }
 0x307   : > { %1812 = vmatpush.bf16.msrb.mxu3 %v3305_v54  ;;  %v3912_v54 = vld [vmem:[%s5066_s9] ss:$0 sm:$0xff] }
 0x30a   : > { %1797 = vmatpush.bf16.msrb.mxu2 %v3325_v63  ;;  %1775 = vmatpush.bf16.msrb.mxu0 %v3173_v22  ;;  %v3182_v63 = vld [vmem:[#allocation2 + $0x1a8] sm:$0xf0] }
 0x30b   : > { %1813 = vmatpush.bf16.msrb.mxu3 %v3281_v23  ;;  %v3185_v44 = vor.u32 %v3724_v62, %v3182_v63  ;;  %v3785_v23 = vld [vmem:[#allocation5 + $0x138] sm:$0xff] }
 0x30c   : > { %2230 = vmatpush.bf16.msra.mxu1 %v3785_v23 }
 0x30e   : > { %1798 = vmatpush.bf16.msrb.mxu2 %v3301_v27  ;;  %v3911_v27 = vld [vmem:[%s5065_s8] ss:$0 sm:$0xff]  ;;  %2216 = vmatpush.bf16.msra.mxu0 %v3777_v26 }
 0x30f   : > { %1814 = vmatpush.bf16.msrb.mxu3 %v3257_v50 }
 0x312   : > { %1799 = vmatpush.bf16.msrb.mxu2 %v3277_v32 }
 0x313   : > { %1815 = vmatpush.bf16.msrb.mxu3 %v3233_v52 }
 0x316   : > { %1800 = vmatpush.bf16.msrb.mxu2 %v3253_v45 }
 0x317   : > { %1816 = vmatpush.bf16.msrb.mxu3 %v3209_v3 }
 0x31a   : > { %1801 = vmatpush.bf16.msrb.mxu2 %v3229_v1 }
 0x31b   : > { %1817 = vmatpush.bf16.msrb.mxu3 %v3185_v44 }
 0x31e   : > { %1802 = vmatpush.bf16.msrb.mxu2 %v3205_v58 }
 0x322   : > { %1803 = vmatpush.bf16.msrb.mxu2 %v3181_v5 }
 0x367   : > { %v1394_v7 = vpop.xlane.xlu2 %1393 }
 0x368   : > { %v1397_v4 = vmul.f32 %v1394_v7, %v4536_v35 }
 0x36a   : > { %v1399_v28 = vadd.f32 1e-05, %v1397_v4 }
 0x36c   : > { %3966 = vrsqrt.f32 %v1399_v28  ;;  %vm1407_vm10 = vweird.f32 %v1399_v28 }
 0x36f   : > { %v1396_v25 = vpop.xlane.xlu2 %1395 }
 0x370   : > { %v1398_v61 = vmul.f32 %v1396_v25, %v4536_v35  ;;  %v3776_v25 = vld [vmem:[#allocation5 + $0xf0] sm:$0xff] }
 0x371   : > { %2217 = vmatpush.bf16.msra.mxu0 %v3776_v25 }
 0x372   : > { %v3967_v56 = vpop.eup %3966  ;;  %v1400_v33 = vadd.f32 1e-05, %v1398_v61 }
 0x373   : > { %v1402_v57 = vmul.f32 %v3967_v56, %v1399_v28  ;;  %vm1408_vm9 = vweird.f32 %v3967_v56  ;;  %v3354_v28 = vld [vmem:[%s5061_s4 + $0xc] sm:$0x77] }
 0x374   : > { %3968 = vrsqrt.f32 %v1400_v33  ;;  %vm1409_vm11 = vmor %vm1407_vm10, %vm1408_vm9  ;;  %vm1417_vm13 = vweird.f32 %v1400_v33  ;;  %v1880_v43 = vperm.slane %v3354_v28, 1  ;;  %v1881_v45 = vperm.slane %v3354_v28, 5 }
 0x375   : > { %v1403_v8 = vmul.f32 %v3967_v56, %v1402_v57  ;;  %v1865_v24 = vperm.slane %v3354_v28, 0  ;;  %v1901_v51 = vperm.slane %v3354_v28, 2  ;;  %v1866_v61 = vperm.slane %v3354_v28, 4 }
 0x376   : > { %v1902_v52 = vperm.slane %v3354_v28, 6  ;;  %v4587_v18 = vperm.slane %v1881_v45, 1  ;;  %v4589_v57 = vperm.slane %v1867_v48, 0 }
 0x377   : > { %v1404_v14 = vmul.f32 0.5, %v1403_v8  ;;  %v4591_v8 = vperm.slane %v1903_v39, 2  ;;  %v4595_v3 = vperm.slane %v1865_v24, 0  ;;  %v4597_v9 = vperm.slane %v1901_v51, 2  ;;  %v3783_v39 = vld [vmem:[#allocation5 + $0x128] sm:$0xff] }
 0x378   : > { %v4599_v41 = vperm.slane %v1866_v61, 0 }
 0x379   : > { %v1405_v46 = vsub.f32 1.5, %v1404_v14  ;;  %v4607_v14 = vld [vmem:[%s5062_s5 + $0x3] sm:$0x7] }
 0x37a   : > { %v3969_v10 = vpop.eup %3968 }
 0x37b   : > { %v1406_v53 = vmul.f32 %v3967_v56, %v1405_v46  ;;  %v1412_v13 = vmul.f32 %v3969_v10, %v1400_v33  ;;  %vm1418_vm12 = vweird.f32 %v3969_v10  ;;  %v4585_v33 = vperm.slane %v1880_v43, 1  ;;  %v3791_v43 = vld [vmem:[#allocation5 + $0x168] sm:$0xff] }
 0x37c   : > { %vm1419_vm14 = vmor %vm1417_vm13, %vm1418_vm12  ;;  %v4609_v46 = vperm.slane %v1902_v52, 2 }
 0x37d   : > { %v1413_v11 = vmul.f32 %v3969_v10, %v1412_v13  ;;  %v1410_v12 = vsel %vm1409_vm11, %v3967_v56, %v1406_v53 }
 0x37e   : > { %v1421_v17 = vmul.f32 %v1410_v12, %v4539_v42  ;;  %v4567_v42 = vld [vmem:[%s5060_s3 + $0x6] sm:$0x3f]  ;;  %v3792_v12 = vld [vmem:[#allocation5 + $0x170] sm:$0xff] }
 0x37f   : > { %v1414_v16 = vmul.f32 0.5, %v1413_v11  ;;  %v1491_v20 = vperm.slane %v4567_v42, 3  ;;  %v1490_v32 = vperm.slane %v4567_v42, 2  ;;  %v1488_v1 = vperm.slane %v4567_v42, 0  ;;  %v3784_v11 = vld [vmem:[#allocation5 + $0x130] sm:$0xff] }
 0x380   : > { %v1427_v4 = vmul.f32 %v3911_v27, %v1421_v17  ;;  %v1489_v56 = vperm.slane %v4567_v42, 1  ;;  %v1492_v5 = vperm.slane %v4567_v42, 4  ;;  %v1493_v17 = vperm.slane %v4567_v42, 5  ;;  %2231 = vmatpush.bf16.msra.mxu1 %v3784_v11 }
 0x381   : > { %v1415_v55 = vsub.f32 1.5, %v1414_v16 }
 0x382   : > { %v4558_v31 = vadd.f32 %v3912_v54, %v1427_v4 }
 0x383   : > { %v1416_v21 = vmul.f32 %v3969_v10, %v1415_v55  ;;  %v1925_v55 = vperm.slane %v4607_v14, 0 }
 0x384   : > { %2232 = vmatpush.bf16.msra.mxu1 %v3783_v39 }
 0x385   : > { %v1420_v7 = vsel %vm1419_vm14, %v3969_v10, %v1416_v21  ;;  %v3775_v21 = vld [vmem:[#allocation5 + $0xe8] sm:$0xff] }
 0x386   : > { %v1422_v15 = vmul.f32 %v1420_v7, %v4544_v47  ;;  %2218 = vmatpush.bf16.msra.mxu0 %v3775_v21 }
 0x388   : > { %v1428_v6 = vmul.f32 %v3911_v27, %v1422_v15  ;;  %v1926_v27 = vperm.slane %v4607_v14, 1 }
 0x38a   : > { %v4560_v22 = vadd.f32 %v3912_v54, %v1428_v6 }
 0x38c   : > { %v1435_v2 = vpack.c.bf16 %v4560_v22, %v4558_v31 }
 0x38e   : > { %1748 = vmatmul.bf16.vlgmr.msra.gmra.mxu2 %v1435_v2  ;;  %1762 = vmatmul.bf16.vlgmr.msra.gmra.mxu3 %v1435_v2 }
 0x38f   : > { %1776 = vmatmul.bf16.vlgmr.msrb.gmra.mxu0 %v1435_v2  ;;  %1790 = vmatmul.bf16.vlgmr.msrb.gmra.mxu1 %v1435_v2 }
 0x390   : > { %2244 = vmatpush.bf16.msra.mxu2 %v3793_v49 }
 0x394   : > { %2245 = vmatpush.bf16.msra.mxu2 %v3792_v12 }
 0x398   : > { %2246 = vmatpush.bf16.msra.mxu2 %v3791_v43 }
 0x39e   : > { %1804 = vmatmul.bf16.vlgmr.msrb.gmra.mxu2 %v1435_v2  ;;  %1818 = vmatmul.bf16.vlgmr.msrb.gmra.mxu3 %v1435_v2  ;;  %v1927_v2 = vperm.slane %v4607_v14, 2 }
 0x40c   : > { %v1777_v47 = vpop.f32.mrf.mxu0  ;;  %v1791_v30 = vpop.f32.mrf.mxu1 }
 0x40d   : > { %v4579_v0 = vadd.f32 %v1791_v30, %v1491_v20  ;;  %v4582_v37 = vadd.f32 %v1777_v47, %v1490_v32 }
 0x40f   : > { %v1973_v62 = vsub.f32 0.0, %v4579_v0  ;;  %v1826_v44 = vrot.slane %v4582_v37, 7  ;;  %v1844_v10 = vrot.slane %v4582_v37, 1  ;;  %v4622_v7 = vmul.f32 %v1888_v38, %v4582_v37 }
 0x411   : > { %v1749_v50 = vpop.f32.mrf.mxu2  ;;  %v1763_v36 = vpop.f32.mrf.mxu3  ;;  %v4629_v47 = vmul.f32 1.442695, %v1973_v62 }
 0x412   : > { %v4602_v63 = vadd.f32 %v1749_v50, %v1488_v1  ;;  %v4616_v16 = vadd.f32 %v1763_v36, %v1489_v56  ;;  %v3774_v36 = vld [vmem:[#allocation5 + $0xe0] sm:$0xff] }
 0x413   : > { %2219 = vmatpush.bf16.msra.mxu0 %v3774_v36 }
 0x414   : > { %v1779_v40 = vpop.f32.mrf.mxu0  ;;  %v1824_v19 = vrot.slane %v4602_v63, 7  ;;  %v1842_v26 = vrot.slane %v4602_v63, 1  ;;  %v4641_v45 = vmul.f32 %v4585_v33, %v4602_v63  ;;  %v1825_v48 = vrot.slane %v4616_v16, 7 }
 0x415   : > { %v4593_v58 = vadd.f32 %v1779_v40, %v1490_v32  ;;  %v1793_v32 = vpop.f32.mrf.mxu1  ;;  %v1843_v25 = vrot.slane %v4616_v16, 1  ;;  %v1890_v24 = vmul.f32 %v4587_v18, %v4616_v16 }
 0x416   : > { %v4650_v51 = vadd.f32 %v1793_v32, %v1491_v20 }
 0x417   : > { %v1829_v53 = vrot.slane %v4593_v58, 7  ;;  %v1847_v13 = vrot.slane %v4593_v58, 1  ;;  %v1894_v50 = vmul.f32 %v1888_v38, %v4593_v58 }
 0x419   : > { %v1832_v54 = vsel %vm948_vm6, %v1826_v44, %v1829_v53  ;;  %v1853_v4 = vsel %vm967_vm7, %v1847_v13, %v1844_v10  ;;  %v1751_v15 = vpop.f32.mrf.mxu2  ;;  %v1765_v6 = vpop.f32.mrf.mxu3  ;;  %v1835_v29 = vsel %vm948_vm6, %v1829_v53, %v1826_v44  ;;  %v3782_v44 = vld [vmem:[#allocation5 + $0x120] sm:$0xff] }
 0x41a   : > { %v1879_v28 = vmul.f32 %v4589_v57, %v1832_v54  ;;  %v1859_v30 = vmul.f32 %v4365_v60, %v1853_v4  ;;  %v4637_v23 = vadd.f32 %v1751_v15, %v1488_v1  ;;  %v1766_v49 = vadd.f32 %v1765_v6, %v1489_v56  ;;  %v3790_v53 = vld [vmem:[#allocation5 + $0x160] sm:$0xff]  ;;  %v3773_v54 = vld [vmem:[#allocation5 + $0xd8] sm:$0xff]  ;;  %2233 = vmatpush.bf16.msra.mxu1 %v3782_v44  ;;  %v3788_v44 = vld [vmem:[#allocation5 + $0x150] sm:$0xff] }
 0x41b   : > { %v1838_v52 = vmul.f32 %v4361_v59, %v1835_v29  ;;  %v1850_v4 = vsel %vm967_vm7, %v1844_v10, %v1847_v13  ;;  %2247 = vmatpush.bf16.msra.mxu2 %v3790_v53  ;;  %2220 = vmatpush.bf16.msra.mxu0 %v3773_v54 }
 0x41c   : > { %v1827_v61 = vrot.slane %v4637_v23, 7  ;;  %v1845_v1 = vrot.slane %v4637_v23, 1  ;;  %v1900_v37 = vadd.f32 %v1894_v50, %v1879_v28  ;;  %v1828_v56 = vrot.slane %v1766_v49, 7  ;;  %v3789_v50 = vld [vmem:[#allocation5 + $0x158] sm:$0xff] }
 0x41d   : > { %v1846_v40 = vrot.slane %v1766_v49, 1  ;;  %v1915_v38 = vmul.f32 %v4591_v8, %v1859_v30  ;;  %v1892_v21 = vmul.f32 %v4585_v33, %v4637_v23  ;;  %v1876_v29 = vmul.f32 %v4589_v57, %v1838_v52 }
 0x41e   : > { %v1830_v58 = vsel %vm948_vm6, %v1824_v19, %v1827_v61  ;;  %v1833_v20 = vsel %vm948_vm6, %v1827_v61, %v1824_v19  ;;  %v1851_v62 = vsel %vm967_vm7, %v1845_v1, %v1842_v26  ;;  %v1831_v15 = vsel %vm948_vm6, %v1825_v48, %v1828_v56 }
 0x41f   : > { %v1836_v11 = vmul.f32 %v4361_v59, %v1833_v20  ;;  %v1857_v12 = vmul.f32 %v4365_v60, %v1851_v62  ;;  %v1877_v16 = vmul.f32 %v4595_v3, %v1830_v58  ;;  %v1834_v6 = vsel %vm948_vm6, %v1828_v56, %v1825_v48  ;;  %v3781_v48 = vld [vmem:[#allocation5 + $0x118] sm:$0xff]  ;;  %2248 = vmatpush.bf16.msra.mxu2 %v3789_v50  ;;  %v3780_v62 = vld [vmem:[#allocation5 + $0x110] sm:$0xff] }
 0x420   : > { %v1852_v19 = vsel %vm967_vm7, %v1846_v40, %v1843_v25  ;;  %v1837_v23 = vmul.f32 %v4361_v59, %v1834_v6  ;;  %v1849_v10 = vsel %vm967_vm7, %v1843_v25, %v1846_v40  ;;  %v1878_v39 = vmul.f32 %v4599_v41, %v1831_v15  ;;  %v3772_v59 = vld [vmem:[#allocation5 + $0xd0] sm:$0xff]  ;;  %2234 = vmatpush.bf16.msra.mxu1 %v3781_v48  ;;  %v3787_v6 = vld [vmem:[#allocation5 + $0x148] sm:$0xff] }
 0x421   : > { %v1805_v28 = vpop.f32.mrf.mxu2  ;;  %v1819_v32 = vpop.f32.mrf.mxu3  ;;  %v1898_v30 = vadd.f32 %v1892_v21, %v1877_v16  ;;  %v1913_v33 = vmul.f32 %v4597_v9, %v1857_v12  ;;  %v1858_v13 = vmul.f32 %v4365_v60, %v1852_v19  ;;  %v1893_v43 = vmul.f32 %v4587_v18, %v1766_v49  ;;  %2221 = vmatpush.bf16.msra.mxu0 %v3772_v59  ;;  %v3770_v19 = vld [vmem:[#allocation5 + $0xc0] sm:$0xff] }
 0x422   : > { %v1921_v36 = vadd.f32 %v1915_v38, %v1900_v37  ;;  %v1874_v57 = vmul.f32 %v4595_v3, %v1836_v11  ;;  %v1875_v52 = vmul.f32 %v4599_v41, %v1837_v23  ;;  %v4690_v60 = vadd.f32 %v1805_v28, %v1492_v5 }
 0x423   : > { %v1919_v61 = vadd.f32 %v1913_v33, %v1898_v30  ;;  %v1899_v56 = vadd.f32 %v1893_v43, %v1878_v39  ;;  %v1914_v58 = vmul.f32 %v4609_v46, %v1858_v13  ;;  %v4694_v18 = vadd.f32 %v1819_v32, %v1493_v17  ;;  %2249 = vmatpush.bf16.msra.mxu2 %v3788_v44 }
 0x424   : > { %v1912_v49 = vmul.f32 %v4591_v8, %v1850_v4  ;;  %v1848_v3 = vsel %vm967_vm7, %v1842_v26, %v1845_v1  ;;  %v1911_v41 = vmul.f32 %v4609_v46, %v1849_v10  ;;  %v1896_v25 = vadd.f32 %v1890_v24, %v1875_v52  ;;  %v3771_v26 = vld [vmem:[#allocation5 + $0xc8] sm:$0xff]  ;;  %2235 = vmatpush.bf16.msra.mxu1 %v3780_v62 }
 0x425   : > { %v1920_v37 = vadd.f32 %v1914_v58, %v1899_v56  ;;  %v1974_v40 = vsub.f32 0.0, %v4690_v60  ;;  %v1897_v38 = vadd.f32 %v4622_v7, %v1876_v29  ;;  %v1975_v20 = vsub.f32 0.0, %v4694_v18  ;;  %2222 = vmatpush.bf16.msra.mxu0 %v3771_v26 }
 0x426   : > { %v1895_v8 = vadd.f32 %v4641_v45, %v1874_v57  ;;  %v4708_v34 = vadd.f32 %v1925_v55, %v1919_v61  ;;  %v1917_v63 = vadd.f32 %v1911_v41, %v1896_v25  ;;  %v4712_v46 = vadd.f32 %v1927_v2, %v1921_v36  ;;  %v3778_v36 = vld [vmem:[#allocation5 + $0x100] sm:$0xff] }
 0x427   : > { %v1981_v24 = vmul.f32 1.442695, %v1974_v40  ;;  %v1918_v1 = vadd.f32 %v1912_v49, %v1897_v38  ;;  %v1983_v7 = vmul.f32 1.442695, %v1975_v20  ;;  %v4716_v11 = vadd.f32 %v1926_v27, %v1920_v37  ;;  %2250 = vmatpush.bf16.msra.mxu2 %v3787_v6 }
 0x428   : > { %v1910_v45 = vmul.f32 %v4597_v9, %v1848_v3  ;;  %v4721_v16 = vadd.f32 %v1926_v27, %v1917_v63  ;;  %v1942_v15 = vsub.f32 0.0, %v4712_v46  ;;  %v3779_v27 = vld [vmem:[#allocation5 + $0x108] sm:$0xff]  ;;  %v1940_v32 = vsub.f32 0.0, %v4708_v34 }
 0x429   : > { %v1807_v53 = vpop.f32.mrf.mxu2  ;;  %v1821_v12 = vpop.f32.mrf.mxu3  ;;  %3970 = vpow2.f32 %v1981_v24  ;;  %v4733_v4 = vadd.f32 %v1927_v2, %v1918_v1  ;;  %v1941_v9 = vsub.f32 0.0, %v4716_v11  ;;  %2236 = vmatpush.bf16.msra.mxu1 %v3779_v27  ;;  %2223 = vmatpush.bf16.msra.mxu0 %v3770_v19 }
 0x42a   : > { %v4725_v21 = vadd.f32 %v1807_v53, %v1492_v5  ;;  %v4729_v54 = vadd.f32 %v1821_v12, %v1493_v17  ;;  %v1976_v5 = vsub.f32 0.0, %v4650_v51  ;;  %v1916_v28 = vadd.f32 %v1910_v45, %v1895_v8 }
 0x42b   : > { %v1938_v42 = vsub.f32 0.0, %v4721_v16  ;;  %v1939_v2 = vsub.f32 0.0, %v4733_v4  ;;  %3972 = vpow2.f32 %v1983_v7  ;;  %v1951_v29 = vmul.f32 1.442695, %v1941_v9 }
 0x42c   : > { %v1977_v17 = vsub.f32 0.0, %v4725_v21  ;;  %3974 = vpow2.f32 %v4629_v47  ;;  %v1953_v10 = vmul.f32 1.442695, %v1942_v15  ;;  %v1978_v13 = vsub.f32 0.0, %v4729_v54  ;;  %v3786_v47 = vld [vmem:[#allocation5 + $0x140] sm:$0xff] }
 0x42d   : > { %v1945_v30 = vmul.f32 1.442695, %v1938_v42  ;;  %v1947_v23 = vmul.f32 1.442695, %v1939_v2  ;;  %3976 = vpow2.f32 %v1951_v29  ;;  %v1985_v39 = vmul.f32 1.442695, %v1976_v5  ;;  %2237 = vmatpush.bf16.msra.mxu1 %v3778_v36  ;;  %2251 = vmatpush.bf16.msra.mxu2 %v3786_v47 }
 0x42e   : > { %v1987_v33 = vmul.f32 1.442695, %v1977_v17  ;;  %v1949_v48 = vmul.f32 1.442695, %v1940_v32  ;;  %v4746_v50 = vadd.f32 %v1925_v55, %v1916_v28  ;;  %v1989_v52 = vmul.f32 1.442695, %v1978_v13 }
 0x42f   : > { %3978 = vpow2.f32 %v1945_v30  ;;  %v3971_v43 = vpop.eup %3970 }
 0x430   : > { %3980 = vpow2.f32 %v1947_v23  ;;  %v1992_v57 = vadd.f32 1.0, %v3971_v43  ;;  %v1937_v58 = vsub.f32 0.0, %v4746_v50 }
 0x431   : > { %3982 = vpow2.f32 %v1987_v33  ;;  %v3973_v61 = vpop.eup %3972 }
 0x432   : > { %3984 = vpow2.f32 %v1953_v10  ;;  %v3975_v59 = vpop.eup %3974  ;;  %v1993_v14 = vadd.f32 1.0, %v3973_v61  ;;  %v1943_v20 = vmul.f32 1.442695, %v1937_v58 }
 0x433   : > { %3986 = vpow2.f32 %v1985_v39  ;;  %v3977_v56 = vpop.eup %3976  ;;  %v1991_v12 = vadd.f32 1.0, %v3975_v59 }
 0x434   : > { %3988 = vpow2.f32 %v1949_v48  ;;  %v1959_v55 = vadd.f32 1.0, %v3977_v56 }
 0x435   : > { %v3979_v49 = vpop.eup %3978  ;;  %3990 = vrcp.f32 %v1992_v57 }
 0x436   : > { %v3981_v3 = vpop.eup %3980  ;;  %v1956_v41 = vadd.f32 1.0, %v3979_v49  ;;  %3992 = vpow2.f32 %v1989_v52  ;;  %v3913_v52 = vld [vmem:[%s5064_s7 + $0x1] ss:$0 sm:$0xff] }
 0x437   : > { %v3983_v25 = vpop.eup %3982  ;;  %v1957_v37 = vadd.f32 1.0, %v3981_v3  ;;  %3994 = vrcp.f32 %v1959_v55 }
 0x438   : > { %v3985_v40 = vpop.eup %3984  ;;  %3996 = vrcp.f32 %v1956_v41  ;;  %v1995_v38 = vadd.f32 1.0, %v3983_v25 }
 0x439   : > { %v3987_v62 = vpop.eup %3986  ;;  %3998 = vrcp.f32 %v1993_v14  ;;  %v1960_v44 = vadd.f32 1.0, %v3985_v40 }
 0x43a   : > { %v3989_v8 = vpop.eup %3988  ;;  %4000 = vrcp.f32 %v1995_v38  ;;  %v1994_v9 = vadd.f32 1.0, %v3987_v62 }
 0x43b   : > { %v3991_v63 = vpop.eup %3990  ;;  %4002 = vrcp.f32 %v1957_v37  ;;  %v1958_v1 = vadd.f32 1.0, %v3989_v8 }
 0x43c   : > { %v3993_v26 = vpop.eup %3992  ;;  %4004 = vpow2.f32 %v1943_v20  ;;  %v2004_v19 = vmul.f32 %v3991_v63, %v4690_v60 }
 0x43d   : > { %v3995_v24 = vpop.eup %3994  ;;  %4006 = vrcp.f32 %v1960_v44  ;;  %v1996_v7 = vadd.f32 1.0, %v3993_v26  ;;  %v3816_v26 = vld [vmem:[%s5067_s10 + $0xb0] sm:$0xf0] }
 0x43e   : > { %v3997_v53 = vpop.eup %3996  ;;  %v1971_v5 = vmul.f32 %v3995_v24, %v4716_v11  ;;  %v3815_v24 = vld [vmem:[%s5067_s10 + $0xac] sm:$0xf] }
 0x43f   : > { %v3999_v45 = vpop.eup %3998  ;;  %v1968_v15 = vmul.f32 %v3997_v53, %v4721_v16  ;;  %4008 = vrcp.f32 %v1996_v7  ;;  %v3544_v7 = vld [vmem:[%s5067_s10 + $0xb4] sm:$0xf0]  ;;  %v3550_v53 = vld [vmem:[%s5067_s10 + $0xb0] sm:$0xf] }
 0x440   : > { %v4001_v27 = vpop.eup %4000  ;;  %4010 = vrcp.f32 %v1958_v1  ;;  %v2005_v16 = vmul.f32 %v3999_v45, %v4694_v18  ;;  %v3547_v45 = vor.u32 %v3815_v24, %v3544_v7  ;;  %v3472_v7 = vld [vmem:[%s5067_s10 + $0x24] sm:$0xf0] }
 0x441   : > { %v4003_v6 = vpop.eup %4002  ;;  %v2007_v28 = vmul.f32 %v4001_v27, %v4725_v21  ;;  %4012 = vrcp.f32 %v1991_v12  ;;  %v2010_v32 = vmul.f32 %v2004_v19, %v1968_v15  ;;  %v3817_v12 = vld [vmem:[%s5067_s10 + $0xb8] sm:$0xf0]  ;;  %v3530_v15 = vld [vmem:[%s5067_s10 + $0x90] sm:$0xf] }
 0x442   : > { %v4005_v42 = vpop.eup %4004  ;;  %4014 = vrcp.f32 %v1994_v9  ;;  %v1969_v30 = vmul.f32 %v4003_v6, %v4733_v4  ;;  %v3551_v9 = vor.u32 %v3817_v12, %v3550_v53  ;;  %2504 = vmatpush.bf16.msrb.mxu0 %v3547_v45  ;;  %v3813_v27 = vld [vmem:[%s5067_s10 + $0x98] sm:$0xf0]  ;;  %v3812_v6 = vld [vmem:[%s5067_s10 + $0x94] sm:$0xf]  ;;  %v3478_v12 = vld [vmem:[%s5067_s10 + $0x20] sm:$0xf] }
 0x443   : > { %v4007_v17 = vpop.eup %4006  ;;  %v2013_v2 = vmul.f32 %v2007_v28, %v1971_v5  ;;  %v1955_v29 = vadd.f32 1.0, %v4005_v42  ;;  %v3531_v19 = vor.u32 %v3813_v27, %v3530_v15  ;;  %v3532_v5 = vld [vmem:[%s5067_s10 + $0x9c] sm:$0xf0]  ;;  %v3538_v28 = vld [vmem:[%s5067_s10 + $0x98] sm:$0xf] }
 0x444   : > { %v1972_v60 = vmul.f32 %v4007_v17, %v4712_v46  ;;  %v2011_v13 = vmul.f32 %v2005_v16, %v1969_v30  ;;  %2517 = vmatpush.bf16.msrb.mxu1 %v3551_v9  ;;  %v3814_v42 = vld [vmem:[%s5067_s10 + $0xa0] sm:$0xf0]  ;;  %v3518_v30 = vld [vmem:[%s5067_s10 + $0x78] sm:$0xf]  ;;  %v3799_v45 = vld [vmem:[%s5067_s10 + $0x28] sm:$0xf0] }
 0x445   : > { %v4009_v33 = vpop.eup %4008  ;;  %v2016_v23 = vpack.c.bf16 %v2013_v2, %v2010_v32  ;;  %4016 = vrcp.f32 %v1955_v29  ;;  %v3535_v32 = vor.u32 %v3812_v6, %v3532_v5  ;;  %v3539_v2 = vor.u32 %v3814_v42, %v3538_v28  ;;  %v3810_v16 = vld [vmem:[%s5067_s10 + $0x80] sm:$0xf0]  ;;  %v3458_v6 = vld [vmem:[%s5067_s10] sm:$0xf] }
 0x446   : > { %v2008_v11 = vmul.f32 %v4009_v33, %v4729_v54  ;;  %v4011_v10 = vpop.eup %4010  ;;  %v3809_v33 = vld [vmem:[%s5067_s10 + $0x7c] sm:$0xf]  ;;  %v3479_v28 = vor.u32 %v3799_v45, %v3478_v12  ;;  %v3794_v42 = vld [vmem:[%s5067_s10 + $0x4] sm:$0xf]  ;;  %v2355_v45 = vld [vmem:[%s5068_s11] sm:$0x7] }
 0x447   : > { %2238 = vmatmul.bf16.vlgmr.msra.gmra.mxu1 %v2016_v23  ;;  %v4013_v21 = vpop.eup %4012  ;;  %v1970_v36 = vmul.f32 %v4011_v10, %v4708_v34  ;;  %2505 = vmatpush.bf16.msrb.mxu0 %v3535_v32  ;;  %v3526_v10 = vld [vmem:[%s5067_s10 + $0x80] sm:$0xf] }
 0x448   : > { %v2014_v39 = vmul.f32 %v2008_v11, %v1972_v60  ;;  %v4015_v43 = vpop.eup %4014  ;;  %v2003_v4 = vmul.f32 %v4013_v21, %v4579_v0  ;;  %2518 = vmatpush.bf16.msrb.mxu1 %v3539_v2  ;;  %v3519_v60 = vor.u32 %v3810_v16, %v3518_v30  ;;  %v3520_v11 = vld [vmem:[%s5067_s10 + $0x84] sm:$0xf0]  ;;  %v3796_v30 = vld [vmem:[%s5067_s10 + $0x10] sm:$0xf0]  ;;  %v3818_v12 = vld [vmem:[%s5069_s12] sm:$0xff] }
 0x449   : > { %v2006_v18 = vmul.f32 %v4015_v43, %v4650_v51  ;;  %v3523_v21 = vor.u32 %v3809_v33, %v3520_v11  ;;  %v3807_v43 = vld [vmem:[%s5067_s10 + $0x68] sm:$0xf0] }
 0x44a   : > { %v2017_v48 = vpack.c.bf16 %v2014_v39, %v2011_v13  ;;  %v3811_v13 = vld [vmem:[%s5067_s10 + $0x88] sm:$0xf0]  ;;  %v3506_v39 = vld [vmem:[%s5067_s10 + $0x60] sm:$0xf] }
 0x44b   : > { %v4017_v47 = vpop.eup %4016  ;;  %v2012_v61 = vmul.f32 %v2006_v18, %v1970_v36  ;;  %v3507_v36 = vor.u32 %v3807_v43, %v3506_v39  ;;  %v3514_v18 = vld [vmem:[%s5067_s10 + $0x68] sm:$0xf]  ;;  %2506 = vmatpush.bf16.msrb.mxu0 %v3523_v21  ;;  %v3841_v39 = vld [vmem:[%s5069_s12 + $0xb8] sm:$0xff] }
 0x44c   : > { %v1967_v57 = vmul.f32 %v4017_v47, %v4746_v50  ;;  %2252 = vmatmul.bf16.vlgmr.msra.gmra.mxu2 %v2017_v48  ;;  %v3527_v48 = vor.u32 %v3811_v13, %v3526_v10  ;;  %v3806_v47 = vld [vmem:[%s5067_s10 + $0x64] sm:$0xf]  ;;  %v3833_v13 = vld [vmem:[%s5069_s12 + $0x78] sm:$0xff] }
 0x44e   : > { %v2009_v46 = vmul.f32 %v2003_v4, %v1967_v57  ;;  %v3508_v4 = vld [vmem:[%s5067_s10 + $0x6c] sm:$0xf0]  ;;  %2519 = vmatpush.bf16.msrb.mxu1 %v3527_v48 }
 0x44f   : > { %v3511_v57 = vor.u32 %v3806_v47, %v3508_v4  ;;  %v3832_v48 = vld [vmem:[%s5069_s12 + $0x70] sm:$0xff] }
 0x450   : > { %v2015_v54 = vpack.c.bf16 %v2012_v61, %v2009_v46  ;;  %v3808_v46 = vld [vmem:[%s5067_s10 + $0x70] sm:$0xf0]  ;;  %v3494_v61 = vld [vmem:[%s5067_s10 + $0x48] sm:$0xf] }
 0x451   : > { %2507 = vmatpush.bf16.msrb.mxu0 %v3511_v57  ;;  %v3840_v4 = vld [vmem:[%s5069_s12 + $0xb0] sm:$0xff] }
 0x452   : > { %2224 = vmatmul.bf16.vlgmr.msra.gmra.mxu0 %v2015_v54  ;;  %v3804_v54 = vld [vmem:[%s5067_s10 + $0x50] sm:$0xf0] }
 0x453   : > { %v3824_v57 = vld [vmem:[%s5069_s12 + $0x30] sm:$0xff] }
 0x4c4   : > { %v2239_v59 = vpop.f32.mrf.mxu1 }
 0x4cc   : > { %v2241_v55 = vpop.f32.mrf.mxu1 }
 0x4cf   : > { %v2225_v56 = vpop.f32.mrf.mxu0  ;;  %v2253_v58 = vpop.f32.mrf.mxu2 }
 0x4d0   : > { %v2226_v34 = vadd.f32 %v3913_v52, %v2225_v56  ;;  %v3496_v56 = vld [vmem:[%s5067_s10 + $0x54] sm:$0xf0] }
 0x4d2   : > { %v2240_v49 = vadd.f32 %v2239_v59, %v2226_v34  ;;  %v3803_v59 = vld [vmem:[%s5067_s10 + $0x4c] sm:$0xf]  ;;  %v3502_v34 = vld [vmem:[%s5067_s10 + $0x50] sm:$0xf] }
 0x4d4   : > { %v2254_v14 = vadd.f32 %v2253_v58, %v2240_v49  ;;  %v3805_v49 = vld [vmem:[%s5067_s10 + $0x58] sm:$0xf0] }
 0x4d6   : > { %v2258_v0 = vadd.f32 %v2254_v14, %v4558_v31 }
 0x4d7   : > { %v2227_v51 = vpop.f32.mrf.mxu0  ;;  %v2255_v3 = vpop.f32.mrf.mxu2 }
 0x4d8   : > { %v2228_v50 = vadd.f32 %v3913_v52, %v2227_v51  ;;  %2260 = vadd.xlane.f32.xlu0 %v2258_v0  ;;  %v3515_v52 = vor.u32 %v3808_v46, %v3514_v18  ;;  %v3499_v51 = vor.u32 %v3803_v59, %v3496_v56  ;;  %v3839_v59 = vld [vmem:[%s5069_s12 + $0xa8] sm:$0xff] }
 0x4d9   : > { %v3823_v56 = vld [vmem:[%s5069_s12 + $0x28] sm:$0xff] }
 0x4da   : > { %v2242_v41 = vadd.f32 %v2241_v55, %v2228_v50  ;;  %v3482_v55 = vld [vmem:[%s5067_s10 + $0x30] sm:$0xf]  ;;  %v3801_v50 = vld [vmem:[%s5067_s10 + $0x38] sm:$0xf0]  ;;  %2520 = vmatpush.bf16.msrb.mxu1 %v3515_v52  ;;  %2508 = vmatpush.bf16.msrb.mxu0 %v3499_v51 }
 0x4dc   : > { %v2256_v25 = vadd.f32 %v2255_v3, %v2242_v41 }
 0x4de   : > { %v2259_v37 = vadd.f32 %v2256_v25, %v4560_v22  ;;  %v3542_v22 = vld [vmem:[%s5067_s10 + $0xa8] sm:$0xf]  ;;  %v3503_v25 = vor.u32 %v3805_v49, %v3502_v34  ;;  %v3830_v34 = vld [vmem:[%s5069_s12 + $0x60] sm:$0xff] }
 0x4df   : > { %v3543_v1 = vor.u32 %v3816_v26, %v3542_v22  ;;  %v3470_v22 = vld [vmem:[%s5067_s10 + $0x18] sm:$0xf]  ;;  %v3798_v26 = vld [vmem:[%s5067_s10 + $0x20] sm:$0xf0] }
 0x4e0   : > { %2262 = vadd.xlane.f32.xlu1 %v2259_v37  ;;  %2521 = vmatpush.bf16.msrb.mxu1 %v3503_v25  ;;  %v3471_v9 = vor.u32 %v3798_v26, %v3470_v22  ;;  %v3827_v22 = vld [vmem:[%s5069_s12 + $0x48] sm:$0xff] }
 0x4e1   : > { %2491 = vmatpush.bf16.msra.mxu3 %v3543_v1  ;;  %v3797_v1 = vld [vmem:[%s5067_s10 + $0x1c] sm:$0xf]  ;;  %v3835_v26 = vld [vmem:[%s5069_s12 + $0x88] sm:$0xff] }
 0x4e2   : > { %v3475_v27 = vor.u32 %v3797_v1, %v3472_v7  ;;  %v3826_v1 = vld [vmem:[%s5069_s12 + $0x40] sm:$0xff] }
 0x4e3   : > { %v3834_v7 = vld [vmem:[%s5069_s12 + $0x80] sm:$0xff] }
 0x4e5   : > { %2492 = vmatpush.bf16.msra.mxu3 %v3531_v19  ;;  %v3795_v19 = vld [vmem:[%s5067_s10 + $0x8] sm:$0xf0] }
 0x4e6   : > { %v3459_v16 = vor.u32 %v3795_v19, %v3458_v6 }
 0x4e9   : > { %2493 = vmatpush.bf16.msra.mxu3 %v3519_v60 }
 0x4ed   : > { %2494 = vmatpush.bf16.msra.mxu3 %v3507_v36  ;;  %v3914_v36 = vld [vmem:[%s5065_s8 + $0x1] ss:$0 sm:$0xff] }
 0x54b   : > { %v2261_v40 = vpop.xlane.xlu0 %2260 }
 0x54c   : > { %v2264_v38 = vmul.f32 %v2261_v40, %v4536_v35 }
 0x54e   : > { %v4767_v20 = vsub.f32 %v2258_v0, %v2264_v38  ;;  %v3495_v0 = vor.u32 %v3804_v54, %v3494_v61  ;;  %v3490_v38 = vld [vmem:[%s5067_s10 + $0x38] sm:$0xf]  ;;  %v3915_v61 = vld [vmem:[%s5066_s9 + $0x1] ss:$0 sm:$0xff] }
 0x550   : > { %v2268_v62 = vmul.f32 %v4767_v20, %v4767_v20  ;;  %2495 = vmatpush.bf16.msra.mxu3 %v3495_v0  ;;  %v3822_v0 = vld [vmem:[%s5069_s12 + $0x20] sm:$0xff] }
 0x552   : > { %2270 = vadd.xlane.f32.xlu2 %v2268_v62  ;;  %v3802_v62 = vld [vmem:[%s5067_s10 + $0x40] sm:$0xf0] }
 0x553   : > { %v2263_v31 = vpop.xlane.xlu1 %2262  ;;  %v3491_v24 = vor.u32 %v3802_v62, %v3490_v38 }
 0x554   : > { %v2265_v44 = vmul.f32 %v2263_v31, %v4536_v35  ;;  %v3483_v31 = vor.u32 %v3801_v50, %v3482_v55  ;;  %v3829_v55 = vld [vmem:[%s5069_s12 + $0x58] sm:$0xff] }
 0x555   : > { %2522 = vmatpush.bf16.msrb.mxu1 %v3491_v24  ;;  %v3820_v24 = vld [vmem:[%s5069_s12 + $0x10] sm:$0xff] }
 0x556   : > { %v4772_v8 = vsub.f32 %v2259_v37, %v2265_v44  ;;  %v3484_v37 = vld [vmem:[%s5067_s10 + $0x3c] sm:$0xf0]  ;;  %2496 = vmatpush.bf16.msra.mxu3 %v3483_v31 }
 0x558   : > { %v2269_v63 = vmul.f32 %v4772_v8, %v4772_v8 }
 0x559   : > { %2523 = vmatpush.bf16.msrb.mxu1 %v3479_v28 }
 0x55a   : > { %2272 = vadd.xlane.f32.xlu1 %v2269_v63  ;;  %2497 = vmatpush.bf16.msra.mxu3 %v3471_v9  ;;  %v2486_v9 = vperm.slane %v2355_v45, 1 }
 0x55e   : > { %2498 = vmatpush.bf16.msra.mxu3 %v3459_v16 }
 0x562   : > { %2742 = vmatpush.bf16.msrb.mxu3 %v3833_v13 }
 0x566   : > { %2743 = vmatpush.bf16.msrb.mxu3 %v3832_v48 }
 0x5c5   : > { %v2271_v17 = vpop.xlane.xlu2 %2270 }
 0x5c6   : > { %v2274_v29 = vmul.f32 %v2271_v17, %v4536_v35  ;;  %v3460_v17 = vld [vmem:[%s5067_s10 + $0xc] sm:$0xf0] }
 0x5c7   : > { %v3463_v60 = vor.u32 %v3794_v42, %v3460_v17  ;;  %v2485_v42 = vperm.slane %v2355_v45, 0 }
 0x5c8   : > { %v4822_v23 = vadd.f32 1e-05, %v2274_v29  ;;  %v3466_v29 = vld [vmem:[%s5067_s10 + $0x8] sm:$0xf] }
 0x5c9   : > { %v3467_v11 = vor.u32 %v3796_v30, %v3466_v29 }
 0x5ca   : > { %4018 = vrsqrt.f32 %v4822_v23  ;;  %vm2284_vm0 = vweird.f32 %v4822_v23 }
 0x5cb   : > { %2524 = vmatpush.bf16.msrb.mxu1 %v3467_v11 }
 0x5cd   : > { %v2273_v58 = vpop.xlane.xlu1 %2272 }
 0x5ce   : > { %v2275_v14 = vmul.f32 %v2273_v58, %v4536_v35  ;;  %v3800_v35 = vld [vmem:[%s5067_s10 + $0x34] sm:$0xf] }
 0x5cf   : > { %v3487_v63 = vor.u32 %v3800_v35, %v3484_v37  ;;  %v3828_v35 = vld [vmem:[%s5069_s12 + $0x50] sm:$0xff] }
 0x5d0   : > { %v4877_v3 = vpop.eup %4018  ;;  %v4879_v41 = vadd.f32 1e-05, %v2275_v14 }
 0x5d1   : > { %v2279_v40 = vmul.f32 %v4877_v3, %v4822_v23  ;;  %2509 = vmatpush.bf16.msrb.mxu0 %v3487_v63  ;;  %vm2285_vm15 = vweird.f32 %v4877_v3  ;;  %v3825_v23 = vld [vmem:[%s5069_s12 + $0x38] sm:$0xff] }
 0x5d2   : > { %4020 = vrsqrt.f32 %v4879_v41  ;;  %vm2286_vm1 = vmor %vm2284_vm0, %vm2285_vm15  ;;  %vm2294_vm3 = vweird.f32 %v4879_v41  ;;  %2729 = vmatpush.bf16.msrb.mxu2 %v3825_v23  ;;  %v2584_v23 = vld [vmem:[%s5070_s13] sm:$0x1] }
 0x5d3   : > { %v2280_v44 = vmul.f32 %v4877_v3, %v2279_v40  ;;  %v3836_v40 = vld [vmem:[%s5069_s12 + $0x90] sm:$0xff] }
 0x5d5   : > { %v2281_v53 = vmul.f32 0.5, %v2280_v44  ;;  %2510 = vmatpush.bf16.msrb.mxu0 %v3475_v27 }
 0x5d6   : > { %2730 = vmatpush.bf16.msrb.mxu2 %v3824_v57 }
 0x5d7   : > { %v2282_v15 = vsub.f32 1.5, %v2281_v53  ;;  %v3819_v53 = vld [vmem:[%s5069_s12 + $0x8] sm:$0xff] }
 0x5d8   : > { %v4021_v5 = vpop.eup %4020 }
 0x5d9   : > { %v2283_v32 = vmul.f32 %v4877_v3, %v2282_v15  ;;  %v2289_v2 = vmul.f32 %v4021_v5, %v4879_v41  ;;  %vm2295_vm2 = vweird.f32 %v4021_v5  ;;  %2511 = vmatpush.bf16.msrb.mxu0 %v3463_v60  ;;  %v3821_v41 = vld [vmem:[%s5069_s12 + $0x18] sm:$0xff]  ;;  %v2487_v15 = vperm.slane %v2355_v45, 2 }
 0x5da   : > { %vm2296_vm4 = vmor %vm2294_vm3, %vm2295_vm2  ;;  %2731 = vmatpush.bf16.msrb.mxu2 %v3823_v56 }
 0x5db   : > { %v2290_v33 = vmul.f32 %v4021_v5, %v2289_v2  ;;  %v2287_v10 = vsel %vm2286_vm1, %v4877_v3, %v2283_v32  ;;  %v3837_v3 = vld [vmem:[%s5069_s12 + $0x98] sm:$0xff] }
 0x5dc   : > { %v2298_v47 = vmul.f32 %v2287_v10, %v4767_v20  ;;  %v3831_v20 = vld [vmem:[%s5069_s12 + $0x68] sm:$0xff] }
 0x5dd   : > { %v2291_v21 = vmul.f32 0.5, %v2290_v33  ;;  %2755 = vmatpush.bf16.msra.mxu0 %v3841_v39  ;;  %2744 = vmatpush.bf16.msrb.mxu3 %v3831_v20 }
 0x5de   : > { %v2305_v54 = vmul.f32 %v3914_v36, %v2298_v47  ;;  %2732 = vmatpush.bf16.msrb.mxu2 %v3822_v0 }
 0x5df   : > { %v2292_v43 = vsub.f32 1.5, %v2291_v21 }
 0x5e0   : > { %v2312_v49 = vadd.f32 %v3915_v61, %v2305_v54 }
 0x5e1   : > { %v2293_v18 = vmul.f32 %v4021_v5, %v2292_v43  ;;  %2756 = vmatpush.bf16.msra.mxu0 %v3840_v4  ;;  %2745 = vmatpush.bf16.msrb.mxu3 %v3830_v34 }
 0x5e2   : > { %2733 = vmatpush.bf16.msrb.mxu2 %v3821_v41 }
 0x5e3   : > { %v2297_v46 = vsel %vm2296_vm4, %v4021_v5, %v2293_v18 }
 0x5e4   : > { %v2299_v52 = vmul.f32 %v2297_v46, %v4772_v8  ;;  %v3838_v8 = vld [vmem:[%s5069_s12 + $0xa0] sm:$0xff] }
 0x5e5   : > { %2757 = vmatpush.bf16.msra.mxu0 %v3839_v59  ;;  %2746 = vmatpush.bf16.msrb.mxu3 %v3829_v55 }
 0x5e6   : > { %v2306_v58 = vmul.f32 %v3914_v36, %v2299_v52  ;;  %2734 = vmatpush.bf16.msrb.mxu2 %v3820_v24 }
 0x5e8   : > { %v2313_v14 = vadd.f32 %v3915_v61, %v2306_v58 }
 0x5e9   : > { %2758 = vmatpush.bf16.msra.mxu0 %v3838_v8  ;;  %2747 = vmatpush.bf16.msrb.mxu3 %v3828_v35 }
 0x5ea   : > { %v2314_v51 = vadd.f32 %v2313_v14, %v2312_v49  ;;  %2735 = vmatpush.bf16.msrb.mxu2 %v3819_v53 }
 0x5ec   : > { %v2315_v50 = vrot.slane %v2314_v51, 4 }
 0x5ed   : > { %2759 = vmatpush.bf16.msra.mxu0 %v3837_v3  ;;  %2748 = vmatpush.bf16.msrb.mxu3 %v3827_v22 }
 0x5ee   : > { %v2316_v25 = vadd.f32 %v2315_v50, %v2314_v51  ;;  %2736 = vmatpush.bf16.msrb.mxu2 %v3818_v12 }
 0x5f0   : > { %v2317_v37 = vrot.slane %v2316_v25, 2 }
 0x5f1   : > { %2760 = vmatpush.bf16.msra.mxu0 %v3836_v40  ;;  %2749 = vmatpush.bf16.msrb.mxu3 %v3826_v1 }
 0x5f2   : > { %v2318_v38 = vadd.f32 %v2317_v37, %v2316_v25 }
 0x5f4   : > { %v2319_v62 = vrot.slane %v2318_v38, 1 }
 0x5f5   : > { %2761 = vmatpush.bf16.msra.mxu0 %v3835_v26 }
 0x5f6   : > { %v2320_v31 = vadd.f32 %v2319_v62, %v2318_v38 }
 0x5f8   : > { %v2321_v44 = vmul.f32 0.0625, %v2320_v31 }
 0x5f9   : > { %2762 = vmatpush.bf16.msra.mxu0 %v3834_v7 }
 0x5fa   : > { %v2322_v63 = vpack.c.bf16 %v2321_v44, %v2321_v44 }
 0x5fc   : > { %2499 = vmatmul.bf16.vlgmr.msra.gmra.mxu3 %v2322_v63  ;;  %2512 = vmatmul.bf16.vlgmr.msrb.gmra.mxu0 %v2322_v63 }
 0x5fd   : > { %2525 = vmatmul.bf16.vlgmr.msrb.gmra.mxu1 %v2322_v63 }
 0x679   : > { %v2513_v27 = vpop.f32.mrf.mxu0 }
 0x67a   : > { %v2514_v6 = vadd.f32 %v2513_v27, %v2486_v9  ;;  %v2526_v19 = vpop.f32.mrf.mxu1 }
 0x67b   : > { %v2527_v5 = vadd.f32 %v2526_v19, %v2487_v15 }
 0x67c   : > { %v2531_v28 = vmax.f32 %v2514_v6, 0.0 }
 0x67d   : > { %v2532_v17 = vmax.f32 %v2527_v5, 0.0 }
 0x67e   : > { %v2534_v32 = vpack.c.bf16 %v2531_v28, %v2531_v28 }
 0x67f   : > { %v2535_v2 = vpack.c.bf16 %v2532_v17, %v2532_v17  ;;  %v2500_v29 = vpop.f32.mrf.mxu3 }
 0x680   : > { %v2501_v30 = vadd.f32 %v2500_v29, %v2485_v42  ;;  %2750 = vmatmul.bf16.vlgmr.msrb.gmra.mxu3 %v2534_v32 }
 0x681   : > { %2763 = vmatmul.bf16.vlgmr.msra.gmra.mxu0 %v2535_v2  ;;  %v2515_v16 = vpop.f32.mrf.mxu0 }
 0x682   : > { %v2530_v33 = vmax.f32 %v2501_v30, 0.0  ;;  %v2528_v60 = vpop.f32.mrf.mxu1 }
 0x684   : > { %v2533_v11 = vpack.c.bf16 %v2530_v33, %v2530_v33 }
 0x686   : > { %2737 = vmatmul.bf16.vlgmr.msrb.gmra.mxu2 %v2533_v11 }
 0x687   : > { %v2502_v10 = vpop.f32.mrf.mxu3 }
 0x6fe   : > { %v2764_v21 = vpop.f32.mrf.mxu0 }
 0x703   : > { %v2751_v13 = vpop.f32.mrf.mxu3 }
 0x706   : > { %v2766_v39 = vpop.f32.mrf.mxu0 }
 0x709   : > { %v2738_v43 = vpop.f32.mrf.mxu2 }
 0x70a   : > { %v2739_v48 = vadd.f32 %v2738_v43, %v2584_v23 }
 0x70b   : > { %v2753_v36 = vpop.f32.mrf.mxu3 }
 0x70c   : > { %v2752_v47 = vadd.f32 %v2751_v13, %v2739_v48 }
 0x70e   : > { %v2765_v4 = vadd.f32 %v2764_v21, %v2752_v47 }
 0x710   : > { %2769 = vst.msk [vmem:[%s494_s24] sm:$0x1] %vm2768_vm5, %v2765_v4 }
 0x711   : > { %v2740_v18 = vpop.f32.mrf.mxu2 }
 0x712   : > { %4109 = shalt.err (!%p4106_p8)
}
 0x713   : > { %3850 = dma.vmem_to_hbm [thread:$0]  (%p4276_p5), %s2782_s25, 16, %s2784_s28, %s2771_s18  }
 0x714 PF: > { %s5087_s27 = sld [smem:[#allocation11_spill]]  ;;  %p3867_p9 = scmp.ge.s32.totalorder %s4152_s16, 2 }
 0x716   : > { %p3860_p10 = pnand %p3867_p9, %p4280_p6 }
 0x718   : > { %p3861_p11 = pneg %p3860_p10 }
 0x71a   : > { %s2795_s22 = sand.u32 1, %s5087_s27  }
 0x71b   : > { %s2796_s24 = scalar_lea.sflag [#allocation4], %s2795_s22 }
 0x71c   : > { %4135 = dma.done.wait (%p3861_p11), %s2796_s24, 16  }
 0x71d   : > { %4137 = vsyncadd (%p3861_p11), %s2796_s24, 4294967280  ;;  %s5089_s16 = sld [smem:[#allocation13_spill]]  ;;  %s5092_s29 = smov %s4144_s30 }
 0x71e   : > { %s5090_s20 = sld [smem:[#allocation12_spill]] }
 0x71f   : > { %s5091_s15 = sld [smem:[#allocation14_spill]] }
 0x723   : > { %p26_p12 = scmp.ge.s32.totalorder %s5089_s16, 4  }
 0x724   : > { %s5093_s30 = smov %s5090_s20 }
 0x725   :  { %28 = sbr.rel (!%p26_p12) target bundleno = 7 (0x7), region = 128 }
 0x72a   :  { %2801 = vsyncpa [#allocation3], 1 }
 0x72b   :  { %2803 = vsyncpa [#allocation3 + $0x1], 1 }
 0x72c   :  { %2804 = vsyncpa [#allocation6], 1 }
 0x72d   :  { %2805 = vsyncpa [#allocation4], 1 }
 0x72e   :  { %2807 = vsyncpa [#allocation4 + $0x1], 1 }

</bundles_post_ra>
